<compile_context>
chip_gen: v7x
topology: tpu7x:2x2x1
jax: 0.10.0
libtpu: 0.0.40
codegen_flags: <defaults>
</compile_context>

<pallas_src>
import jax
import jax.numpy as jnp
from jax.experimental import pallas as pl
from jax.experimental.pallas import tpu as pltpu

LRELU_SLOPE = 0.2
LN_EPS = 1e-5


def _leaky_relu(v):
    return jnp.where(v > 0, v, LRELU_SLOPE * v)


def _layernorm(h, gamma, beta):
    # two-pass statistics in f32 (h is already f32)
    mu = jnp.mean(h, axis=-1, keepdims=True)
    d = h - mu
    var = jnp.mean(d * d, axis=-1, keepdims=True)
    return d * jax.lax.rsqrt(var + LN_EPS) * gamma + beta


def _make_resblock_kernel(T, tile_T, K, D):
    pad = D * (K - 1) // 2
    R = tile_T + 4 * pad        # halo'd input rows per tile (2*pad per conv per side)
    y1 = tile_T + 2 * pad       # conv1 rows needed so conv2 has its own halo

    def kernel(x_hbm, w1_ref, w2_ref, vec_ref, o_ref, xbuf, sem):
        b = pl.program_id(0)
        t = pl.program_id(1)
        nt = pl.num_programs(1)
        slot = t & 1

        # x was pre-padded by 2*pad on the left in the wrapper, so the halo window of tile tt
        # simply starts at tt * tile_T (always in-bounds, sublane-aligned).
        def halo_copy(bb, tt, s):
            start = pl.multiple_of(tt * tile_T, tile_T)
            return pltpu.make_async_copy(
                x_hbm.at[bb, pl.ds(start, R), :], xbuf.at[s], sem.at[s])

        # Prime the pipeline on the first tile of this batch row (t axis is "arbitrary", so
        # every core that owns a batch row starts it at t == 0).
        @pl.when(t == 0)
        def _():
            halo_copy(b, t, slot).start()

        # Prefetch next tile's halo window into the other slot; overlaps with this compute.
        @pl.when(t + 1 < nt)
        def _():
            halo_copy(b, t + 1, (t + 1) & 1).start()

        # Wait for this tile's halo window (issued at priming or by the previous step).
        halo_copy(b, t, slot).wait()

        xh = xbuf[slot]                                    # (R, C)   MXU dtype
        v = vec_ref[...].astype(jnp.float32)               # (6, C): b1,g1,bt1,b2,g2,bt2

        # ---- conv1: K taps fused into one (y1, K*C) @ (K*C, C) MXU matmul ----
        taps1 = jnp.concatenate(
            [xh[k * D:k * D + y1, :] for k in range(K)], axis=-1)
        a1 = jnp.dot(taps1, w1_ref[...],
                     preferred_element_type=jnp.float32) + v[0:1]
        h1 = _leaky_relu(_layernorm(a1, v[1:2], v[2:3]))

        # Zero every conv1 row whose global position is outside [0, T): reproduces conv2's
        # 'same' zero padding at both sequence ends and masks any ragged tail rows.
        g = (t * tile_T - pad
             + jax.lax.broadcasted_iota(jnp.int32, (y1, 1), 0))
        h1 = jnp.where((g >= 0) & (g < T), h1, 0.0)

        # ---- conv2 on the central tile_T rows (same fused-tap matmul) ----
        h1c = h1.astype(xh.dtype)
        taps2 = jnp.concatenate(
            [h1c[k * D:k * D + tile_T, :] for k in range(K)], axis=-1)
        a2 = jnp.dot(taps2, w2_ref[...],
                     preferred_element_type=jnp.float32) + v[3:4]
        h2 = _layernorm(a2, v[4:5], v[5:6])

        # residual = central rows of the halo window (bf16-rounded x on the bf16 path)
        res = xh[2 * pad:2 * pad + tile_T, :].astype(jnp.float32)
        o_ref[0] = _leaky_relu(h2 + res).astype(o_ref.dtype)

    return kernel


def resblock_pallas(x, params, kernel_size=3, dilation=1, tile_T=512,
                    compute_dtype=None, vmem_limit_bytes=None):
    """x: (B, T, C) channels-last.  params = (w1, b1, g1, bt1, w2, b2, g2, bt2);
    conv weights are (K, C_in, C_out), vectors are (1, C).

    Matmuls / halo traffic run in `compute_dtype` (default: x.dtype) — pass bf16 for the
    bf16 MXU rate and half the HBM traffic on v6e/v7x; LN/bias/residual math is f32 and the
    output dtype matches x.dtype.  tile_T: sweep 512-1024 (2048 still fits VMEM but pass
    vmem_limit_bytes on v5e's 16 MiB default scoped limit).  On v7x, megacore is split over
    the batch axis, so B >= 2 keeps both TensorCores busy.
    """
    w1, b1, g1, bt1, w2, b2, g2, bt2 = params
    B, T, C = x.shape
    K, D = kernel_size, dilation
    pad = D * (K - 1) // 2
    cdt = jnp.dtype(compute_dtype) if compute_dtype is not None else x.dtype

    if T <= tile_T:
        tile_T, nt = T, 1                        # single tile: block == full array dims
    else:
        tile_T = max(16, (tile_T // 16) * 16)    # sublane-aligned even for bf16 packing
        nt = pl.cdiv(T, tile_T)

    R = tile_T + 4 * pad

    # Pre-pad time (left: 2*pad 'same' zeros; right: ragged tail + 2*pad zeros) so every halo
    # window is in-bounds and conv1's left/right zero padding is physically present.
    x_p = jnp.pad(x, ((0, 0), (2 * pad, nt * tile_T - T + 2 * pad), (0, 0))).astype(cdt)
    # Fused-tap conv weights: (K, C_in, C_out) -> (K*C_in, C_out).
    w1f = jnp.reshape(w1, (K * C, C)).astype(cdt)
    w2f = jnp.reshape(w2, (K * C, C)).astype(cdt)
    # All six per-channel vectors packed into one (6, C) f32 input (one DMA / one buffer).
    vec = jnp.concatenate([b1, g1, bt1, b2, g2, bt2], axis=0).astype(jnp.float32)

    # batch axis parallel (megacore); time-tile axis arbitrary (sequential prefetch chain).
    cp = dict(dimension_semantics=("parallel", "arbitrary"))
    if vmem_limit_bytes is not None:
        cp["vmem_limit_bytes"] = int(vmem_limit_bytes)

    return pl.pallas_call(
        _make_resblock_kernel(T, tile_T, K, D),
        out_shape=jax.ShapeDtypeStruct((B, T, C), x.dtype),
        grid=(B, nt),
        in_specs=[
            pl.BlockSpec(memory_space=pl.ANY),               # x_p: halo windows DMA'd manually
            pl.BlockSpec((K * C, C), lambda b, t: (0, 0)),   # fused conv1 weight
            pl.BlockSpec((K * C, C), lambda b, t: (0, 0)),   # fused conv2 weight
            pl.BlockSpec((6, C), lambda b, t: (0, 0)),       # b1,g1,bt1,b2,g2,bt2
        ],
        out_specs=pl.BlockSpec((1, tile_T, C), lambda b, t: (b, t, 0)),
        scratch_shapes=[pltpu.VMEM((2, R, C), cdt),          # double-buffered halo windows
                        pltpu.SemaphoreType.DMA((2,))],
        compiler_params=pltpu.CompilerParams(**cp),
    )(x_p, w1f, w2f, vec)


def resblock_ref(x, params, dilation=1):
    """Pure-JAX reference matching the PyTorch forward (for validation)."""
    w1, b1, g1, bt1, w2, b2, g2, bt2 = params

    def conv(h, w, b):  # h: (B, T, C), w: (K, Cin, Cout)
        w_oik = jnp.transpose(w, (2, 1, 0))                  # (Cout, Cin, K)
        y = jax.lax.conv_general_dilated(
            jnp.transpose(h, (0, 2, 1)), w_oik,
            window_strides=(1,), padding='SAME',
            rhs_dilation=(dilation,),
            dimension_numbers=('NCH', 'OIH', 'NCH'))
        return jnp.transpose(y, (0, 2, 1)) + b[0]

    def ln(h, g, beta):
        mu = jnp.mean(h, -1, keepdims=True)
        var = jnp.mean((h - mu) ** 2, -1, keepdims=True)
        return (h - mu) / jnp.sqrt(var + LN_EPS) * g[0] + beta[0]

    h = _leaky_relu(ln(conv(x, w1, b1), g1, bt1))
    h = ln(conv(h, w2, b2), g2, bt2)
    return _leaky_relu(h + x)


if __name__ == "__main__":
    B, T, C, K = 2, 200, 128, 3     # T=200: multiple time tiles + ragged final block
    key = jax.random.PRNGKey(0)
    kx, k1, k2, k3, k4, k5, k6, k7, k8 = jax.random.split(key, 9)

    x = jax.random.normal(kx, (B, T, C), jnp.float32)
    w1 = 0.2 * jax.random.normal(k1, (K, C, C), jnp.float32)   # (K, Cin, Cout)
    b1 = 0.1 * jax.random.normal(k2, (1, C), jnp.float32)
    w2 = 0.2 * jax.random.normal(k3, (K, C, C), jnp.float32)
    b2 = 0.1 * jax.random.normal(k4, (1, C), jnp.float32)
    g1 = 1.0 + 0.1 * jax.random.normal(k5, (1, C), jnp.float32)
    bt1 = 0.1 * jax.random.normal(k6, (1, C), jnp.float32)
    g2 = 1.0 + 0.1 * jax.random.normal(k7, (1, C), jnp.float32)
    bt2 = 0.1 * jax.random.normal(k8, (1, C), jnp.float32)
    params = (w1, b1, g1, bt1, w2, b2, g2, bt2)

    ref = resblock_ref(x, params, dilation=1)

    # f32, multi-tile path (tile_T=64 -> nt=4): exercises the priming + prefetch chain,
    # both boundary halos, the ragged tail mask, and the partial final output block.
    out = jax.block_until_ready(
        resblock_pallas(x, params, kernel_size=K, dilation=1, tile_T=64))
    assert out.shape == (B, T, C) and out.dtype == x.dtype
    assert jnp.allclose(out, ref, atol=5e-2, rtol=0.0), "f32 multi-tile mismatch vs reference"

    # f32, default large-tile path (T <= tile_T -> single tile per batch row).
    out1 = jax.block_until_ready(
        resblock_pallas(x, params, kernel_size=K, dilation=1))
    assert jnp.allclose(out1, ref, atol=5e-2, rtol=0.0), "f32 single-tile mismatch vs reference"

    # bf16 MXU path: x and conv weights in bf16, LN/bias/residual math stays f32.
    xb = x.astype(jnp.bfloat16)
    outb = jax.block_until_ready(
        resblock_pallas(xb, params, kernel_size=K, dilation=1, tile_T=64))
    assert outb.shape == (B, T, C) and outb.dtype == jnp.bfloat16
    max_err = jnp.max(jnp.abs(outb.astype(jnp.float32) - ref))
    assert max_err < 0.2, f"bf16 path max err {max_err}"

    print("KERNEL_OK")
</pallas_src>

<mosaic_0001>
module attributes {stable_mosaic.version = 11 : i64} {
  func.func @kernel(%arg0: i32, %arg1: i32, %arg2: memref<2x260x128xf32, #tpu.memory_space<any>>, %arg3: memref<384x128xf32, #tpu.memory_space<vmem>>, %arg4: memref<384x128xf32, #tpu.memory_space<vmem>>, %arg5: memref<6x128xf32, #tpu.memory_space<vmem>>, %arg6: memref<1x64x128xf32, #tpu.memory_space<vmem>>, %arg7: memref<2x68x128xf32, #tpu.memory_space<vmem>>, %arg8: memref<2x!tpu.dma_semaphore, #tpu.memory_space<semaphore_mem>>) attributes {dimension_semantics = [#tpu.dimension_semantics<parallel>, #tpu.dimension_semantics<arbitrary>], iteration_bounds = array<i64: 2, 4>, scalar_prefetch = 0 : i64, scratch_operands = 2 : i64, tpu.core_type = #tpu.core_type<tc>, window_params = [{}, {pipeline_mode = #tpu.pipeline_mode<synchronous>, transform_indices = @transform_1, window_bounds = array<i64: 384, 128>}, {pipeline_mode = #tpu.pipeline_mode<synchronous>, transform_indices = @transform_2, window_bounds = array<i64: 384, 128>}, {pipeline_mode = #tpu.pipeline_mode<synchronous>, transform_indices = @transform_3, window_bounds = array<i64: 6, 128>}, {transform_indices = @transform_4, window_bounds = array<i64: 1, 64, 128>}]} {
    %c1_i32 = arith.constant 1 : i32
    %0 = arith.andi %arg1, %c1_i32 : i32
    %c0_i32 = arith.constant 0 : i32
    %1 = arith.cmpi eq, %arg1, %c0_i32 : i32
    %2 = arith.extui %1 : i1 to i32
    %c0_i32_0 = arith.constant 0 : i32
    %3 = arith.cmpi ne, %2, %c0_i32_0 : i32
    scf.if %3 {
      %c64_i32_35 = arith.constant 64 : i32
      %111 = arith.muli %arg1, %c64_i32_35 : i32
      %112 = tpu.assume_multiple %111, 64 : i32
      %c0_i32_36 = arith.constant 0 : i32
      %113 = tpu.memref_slice %arg2[%arg0, %112, %c0_i32_36] : memref<2x260x128xf32, #tpu.memory_space<any>> -> memref<1x68x128xf32, #tpu.memory_space<any>>
      %114 = tpu.memref_squeeze %113 : memref<1x68x128xf32, #tpu.memory_space<any>> -> memref<68x128xf32, #tpu.memory_space<any>>
      %c0_i32_37 = arith.constant 0 : i32
      %c0_i32_38 = arith.constant 0 : i32
      %115 = tpu.memref_slice %arg7[%0, %c0_i32_37, %c0_i32_38] : memref<2x68x128xf32, #tpu.memory_space<vmem>> -> memref<1x68x128xf32, #tpu.memory_space<vmem>>
      %116 = tpu.memref_squeeze %115 : memref<1x68x128xf32, #tpu.memory_space<vmem>> -> memref<68x128xf32, #tpu.memory_space<vmem>>
      %117 = tpu.memref_slice %arg8[%0] : memref<2x!tpu.dma_semaphore, #tpu.memory_space<semaphore_mem>> -> memref<1x!tpu.dma_semaphore, #tpu.memory_space<semaphore_mem>>
      %118 = tpu.memref_squeeze %117 : memref<1x!tpu.dma_semaphore, #tpu.memory_space<semaphore_mem>> -> memref<!tpu.dma_semaphore, #tpu.memory_space<semaphore_mem>>
      tpu.enqueue_dma source(%114 : memref<68x128xf32, #tpu.memory_space<any>>) target(%116 : memref<68x128xf32, #tpu.memory_space<vmem>>) target_semaphore(%118 : memref<!tpu.dma_semaphore, #tpu.memory_space<semaphore_mem>>)
    } else {
    }
    %c1_i32_1 = arith.constant 1 : i32
    %4 = arith.addi %arg1, %c1_i32_1 : i32
    %c4_i32 = arith.constant 4 : i32
    %5 = arith.cmpi slt, %4, %c4_i32 : i32
    %6 = arith.extui %5 : i1 to i32
    %c0_i32_2 = arith.constant 0 : i32
    %7 = arith.cmpi ne, %6, %c0_i32_2 : i32
    scf.if %7 {
      %c1_i32_35 = arith.constant 1 : i32
      %111 = arith.addi %arg1, %c1_i32_35 : i32
      %c1_i32_36 = arith.constant 1 : i32
      %112 = arith.addi %arg1, %c1_i32_36 : i32
      %c1_i32_37 = arith.constant 1 : i32
      %113 = arith.andi %112, %c1_i32_37 : i32
      %c64_i32_38 = arith.constant 64 : i32
      %114 = arith.muli %111, %c64_i32_38 : i32
      %115 = tpu.assume_multiple %114, 64 : i32
      %c0_i32_39 = arith.constant 0 : i32
      %116 = tpu.memref_slice %arg2[%arg0, %115, %c0_i32_39] : memref<2x260x128xf32, #tpu.memory_space<any>> -> memref<1x68x128xf32, #tpu.memory_space<any>>
      %117 = tpu.memref_squeeze %116 : memref<1x68x128xf32, #tpu.memory_space<any>> -> memref<68x128xf32, #tpu.memory_space<any>>
      %c0_i32_40 = arith.constant 0 : i32
      %c0_i32_41 = arith.constant 0 : i32
      %118 = tpu.memref_slice %arg7[%113, %c0_i32_40, %c0_i32_41] : memref<2x68x128xf32, #tpu.memory_space<vmem>> -> memref<1x68x128xf32, #tpu.memory_space<vmem>>
      %119 = tpu.memref_squeeze %118 : memref<1x68x128xf32, #tpu.memory_space<vmem>> -> memref<68x128xf32, #tpu.memory_space<vmem>>
      %120 = tpu.memref_slice %arg8[%113] : memref<2x!tpu.dma_semaphore, #tpu.memory_space<semaphore_mem>> -> memref<1x!tpu.dma_semaphore, #tpu.memory_space<semaphore_mem>>
      %121 = tpu.memref_squeeze %120 : memref<1x!tpu.dma_semaphore, #tpu.memory_space<semaphore_mem>> -> memref<!tpu.dma_semaphore, #tpu.memory_space<semaphore_mem>>
      tpu.enqueue_dma source(%117 : memref<68x128xf32, #tpu.memory_space<any>>) target(%119 : memref<68x128xf32, #tpu.memory_space<vmem>>) target_semaphore(%121 : memref<!tpu.dma_semaphore, #tpu.memory_space<semaphore_mem>>)
    } else {
    }
    %c64_i32 = arith.constant 64 : i32
    %8 = arith.muli %arg1, %c64_i32 : i32
    %9 = tpu.assume_multiple %8, 64 : i32
    %c0_i32_3 = arith.constant 0 : i32
    %10 = tpu.memref_slice %arg2[%arg0, %9, %c0_i32_3] : memref<2x260x128xf32, #tpu.memory_space<any>> -> memref<1x68x128xf32, #tpu.memory_space<any>>
    %11 = tpu.memref_squeeze %10 : memref<1x68x128xf32, #tpu.memory_space<any>> -> memref<68x128xf32, #tpu.memory_space<any>>
    %c0_i32_4 = arith.constant 0 : i32
    %c0_i32_5 = arith.constant 0 : i32
    %12 = tpu.memref_slice %arg7[%0, %c0_i32_4, %c0_i32_5] : memref<2x68x128xf32, #tpu.memory_space<vmem>> -> memref<1x68x128xf32, #tpu.memory_space<vmem>>
    %13 = tpu.memref_squeeze %12 : memref<1x68x128xf32, #tpu.memory_space<vmem>> -> memref<68x128xf32, #tpu.memory_space<vmem>>
    %14 = tpu.memref_slice %arg8[%0] : memref<2x!tpu.dma_semaphore, #tpu.memory_space<semaphore_mem>> -> memref<1x!tpu.dma_semaphore, #tpu.memory_space<semaphore_mem>>
    %15 = tpu.memref_squeeze %14 : memref<1x!tpu.dma_semaphore, #tpu.memory_space<semaphore_mem>> -> memref<!tpu.dma_semaphore, #tpu.memory_space<semaphore_mem>>
    tpu.wait_dma2 semaphore(%15 : memref<!tpu.dma_semaphore, #tpu.memory_space<semaphore_mem>>) src(%11 : memref<68x128xf32, #tpu.memory_space<any>>) dst(%13 : memref<68x128xf32, #tpu.memory_space<vmem>>)
    %16 = arith.index_cast %0 : i32 to index
    %c0 = arith.constant 0 : index
    %c0_6 = arith.constant 0 : index
    %17 = vector.load %arg7[%16, %c0, %c0_6] : memref<2x68x128xf32, #tpu.memory_space<vmem>>, vector<1x68x128xf32>
    %18 = vector.shape_cast %17 : vector<1x68x128xf32> to vector<68x128xf32>
    %c0_7 = arith.constant 0 : index
    %c0_8 = arith.constant 0 : index
    %19 = vector.load %arg5[%c0_7, %c0_8] : memref<6x128xf32, #tpu.memory_space<vmem>>, vector<6x128xf32>
    %20 = vector.extract_strided_slice %18 {offsets = [0, 0], sizes = [66, 128], strides = [1, 1]} : vector<68x128xf32> to vector<66x128xf32>
    %21 = vector.extract_strided_slice %18 {offsets = [1, 0], sizes = [66, 128], strides = [1, 1]} : vector<68x128xf32> to vector<66x128xf32>
    %22 = vector.extract_strided_slice %18 {offsets = [2, 0], sizes = [66, 128], strides = [1, 1]} : vector<68x128xf32> to vector<66x128xf32>
    %23 = tpu.concatenate %20, %21, %22 in 1 : vector<66x128xf32>, vector<66x128xf32>, vector<66x128xf32> -> vector<66x384xf32>
    %c0_9 = arith.constant 0 : index
    %c0_10 = arith.constant 0 : index
    %24 = vector.load %arg3[%c0_9, %c0_10] : memref<384x128xf32, #tpu.memory_space<vmem>>, vector<384x128xf32>
    %cst = arith.constant dense<0.000000e+00> : vector<66x128xf32>
    %25 = tpu.matmul %23, %24, %cst {dimension_numbers = #tpu.dot_dimension_numbers<[1], [0], [0], [1], [0, 0, 1, 1], [], []>} : vector<66x384xf32>, vector<384x128xf32>, vector<66x128xf32> -> vector<66x128xf32>
    %26 = vector.extract_strided_slice %19 {offsets = [0, 0], sizes = [1, 128], strides = [1, 1]} : vector<6x128xf32> to vector<1x128xf32>
    %27 = vector.broadcast %26 : vector<1x128xf32> to vector<66x128xf32>
    %28 = arith.addf %25, %27 : vector<66x128xf32>
    %29 = vector.extract_strided_slice %19 {offsets = [1, 0], sizes = [1, 128], strides = [1, 1]} : vector<6x128xf32> to vector<1x128xf32>
    %30 = vector.extract_strided_slice %19 {offsets = [2, 0], sizes = [1, 128], strides = [1, 1]} : vector<6x128xf32> to vector<1x128xf32>
    %cst_11 = arith.constant dense<0.000000e+00> : vector<66xf32>
    %31 = vector.multi_reduction <add>, %28, %cst_11 [1] : vector<66x128xf32> to vector<66xf32>
    %32 = vector.shape_cast %31 : vector<66xf32> to vector<66x1xf32>
    %cst_12 = arith.constant 1.280000e+02 : f32
    %33 = vector.broadcast %cst_12 : f32 to vector<66x1xf32>
    %34 = arith.divf %32, %33 : vector<66x1xf32>
    %35 = vector.broadcast %34 : vector<66x1xf32> to vector<66x128xf32>
    %36 = arith.subf %28, %35 : vector<66x128xf32>
    %37 = arith.mulf %36, %36 : vector<66x128xf32>
    %cst_13 = arith.constant dense<0.000000e+00> : vector<66xf32>
    %38 = vector.multi_reduction <add>, %37, %cst_13 [1] : vector<66x128xf32> to vector<66xf32>
    %39 = vector.shape_cast %38 : vector<66xf32> to vector<66x1xf32>
    %cst_14 = arith.constant 1.280000e+02 : f32
    %40 = vector.broadcast %cst_14 : f32 to vector<66x1xf32>
    %41 = arith.divf %39, %40 : vector<66x1xf32>
    %cst_15 = arith.constant 9.99999974E-6 : f32
    %42 = vector.broadcast %cst_15 : f32 to vector<66x1xf32>
    %43 = arith.addf %41, %42 : vector<66x1xf32>
    %44 = math.rsqrt %43 : vector<66x1xf32>
    %45 = vector.broadcast %44 : vector<66x1xf32> to vector<66x128xf32>
    %46 = arith.mulf %36, %45 : vector<66x128xf32>
    %47 = vector.broadcast %29 : vector<1x128xf32> to vector<66x128xf32>
    %48 = arith.mulf %46, %47 : vector<66x128xf32>
    %49 = vector.broadcast %30 : vector<1x128xf32> to vector<66x128xf32>
    %50 = arith.addf %48, %49 : vector<66x128xf32>
    %cst_16 = arith.constant 0.000000e+00 : f32
    %51 = vector.broadcast %cst_16 : f32 to vector<66x128xf32>
    %52 = arith.cmpf ogt, %50, %51 : vector<66x128xf32>
    %cst_17 = arith.constant 2.000000e-01 : f32
    %53 = vector.broadcast %cst_17 : f32 to vector<66x128xf32>
    %54 = arith.mulf %53, %50 : vector<66x128xf32>
    %55 = arith.select %52, %50, %54 : vector<66x128xi1>, vector<66x128xf32>
    %c64_i32_18 = arith.constant 64 : i32
    %56 = arith.muli %arg1, %c64_i32_18 : i32
    %c1_i32_19 = arith.constant 1 : i32
    %57 = arith.subi %56, %c1_i32_19 : i32
    %58 = tpu.iota {dimensions = array<i32: 0>} : vector<66x1xi32>
    %59 = vector.broadcast %57 : i32 to vector<66x1xi32>
    %60 = arith.addi %59, %58 : vector<66x1xi32>
    %c0_i32_20 = arith.constant 0 : i32
    %61 = vector.broadcast %c0_i32_20 : i32 to vector<66x1xi32>
    %62 = arith.cmpi sge, %60, %61 : vector<66x1xi32>
    %c200_i32 = arith.constant 200 : i32
    %63 = vector.broadcast %c200_i32 : i32 to vector<66x1xi32>
    %64 = arith.cmpi slt, %60, %63 : vector<66x1xi32>
    %65 = arith.andi %62, %64 : vector<66x1xi1>
    %cst_21 = arith.constant 0.000000e+00 : f32
    %66 = vector.shape_cast %65 : vector<66x1xi1> to vector<66x1xi1>
    %67 = vector.broadcast %66 : vector<66x1xi1> to vector<66x128xi1>
    %68 = vector.broadcast %cst_21 : f32 to vector<66x128xf32>
    %69 = arith.select %67, %55, %68 : vector<66x128xi1>, vector<66x128xf32>
    %70 = vector.extract_strided_slice %69 {offsets = [0, 0], sizes = [64, 128], strides = [1, 1]} : vector<66x128xf32> to vector<64x128xf32>
    %71 = vector.extract_strided_slice %69 {offsets = [1, 0], sizes = [64, 128], strides = [1, 1]} : vector<66x128xf32> to vector<64x128xf32>
    %72 = vector.extract_strided_slice %69 {offsets = [2, 0], sizes = [64, 128], strides = [1, 1]} : vector<66x128xf32> to vector<64x128xf32>
    %73 = tpu.concatenate %70, %71, %72 in 1 : vector<64x128xf32>, vector<64x128xf32>, vector<64x128xf32> -> vector<64x384xf32>
    %c0_22 = arith.constant 0 : index
    %c0_23 = arith.constant 0 : index
    %74 = vector.load %arg4[%c0_22, %c0_23] : memref<384x128xf32, #tpu.memory_space<vmem>>, vector<384x128xf32>
    %cst_24 = arith.constant dense<0.000000e+00> : vector<64x128xf32>
    %75 = tpu.matmul %73, %74, %cst_24 {dimension_numbers = #tpu.dot_dimension_numbers<[1], [0], [0], [1], [0, 0, 1, 1], [], []>} : vector<64x384xf32>, vector<384x128xf32>, vector<64x128xf32> -> vector<64x128xf32>
    %76 = vector.extract_strided_slice %19 {offsets = [3, 0], sizes = [1, 128], strides = [1, 1]} : vector<6x128xf32> to vector<1x128xf32>
    %77 = vector.broadcast %76 : vector<1x128xf32> to vector<64x128xf32>
    %78 = arith.addf %75, %77 : vector<64x128xf32>
    %79 = vector.extract_strided_slice %19 {offsets = [4, 0], sizes = [1, 128], strides = [1, 1]} : vector<6x128xf32> to vector<1x128xf32>
    %80 = vector.extract_strided_slice %19 {offsets = [5, 0], sizes = [1, 128], strides = [1, 1]} : vector<6x128xf32> to vector<1x128xf32>
    %cst_25 = arith.constant dense<0.000000e+00> : vector<64xf32>
    %81 = vector.multi_reduction <add>, %78, %cst_25 [1] : vector<64x128xf32> to vector<64xf32>
    %82 = vector.shape_cast %81 : vector<64xf32> to vector<64x1xf32>
    %cst_26 = arith.constant 1.280000e+02 : f32
    %83 = vector.broadcast %cst_26 : f32 to vector<64x1xf32>
    %84 = arith.divf %82, %83 : vector<64x1xf32>
    %85 = vector.broadcast %84 : vector<64x1xf32> to vector<64x128xf32>
    %86 = arith.subf %78, %85 : vector<64x128xf32>
    %87 = arith.mulf %86, %86 : vector<64x128xf32>
    %cst_27 = arith.constant dense<0.000000e+00> : vector<64xf32>
    %88 = vector.multi_reduction <add>, %87, %cst_27 [1] : vector<64x128xf32> to vector<64xf32>
    %89 = vector.shape_cast %88 : vector<64xf32> to vector<64x1xf32>
    %cst_28 = arith.constant 1.280000e+02 : f32
    %90 = vector.broadcast %cst_28 : f32 to vector<64x1xf32>
    %91 = arith.divf %89, %90 : vector<64x1xf32>
    %cst_29 = arith.constant 9.99999974E-6 : f32
    %92 = vector.broadcast %cst_29 : f32 to vector<64x1xf32>
    %93 = arith.addf %91, %92 : vector<64x1xf32>
    %94 = math.rsqrt %93 : vector<64x1xf32>
    %95 = vector.broadcast %94 : vector<64x1xf32> to vector<64x128xf32>
    %96 = arith.mulf %86, %95 : vector<64x128xf32>
    %97 = vector.broadcast %79 : vector<1x128xf32> to vector<64x128xf32>
    %98 = arith.mulf %96, %97 : vector<64x128xf32>
    %99 = vector.broadcast %80 : vector<1x128xf32> to vector<64x128xf32>
    %100 = arith.addf %98, %99 : vector<64x128xf32>
    %101 = vector.extract_strided_slice %18 {offsets = [2, 0], sizes = [64, 128], strides = [1, 1]} : vector<68x128xf32> to vector<64x128xf32>
    %102 = arith.addf %100, %101 : vector<64x128xf32>
    %cst_30 = arith.constant 0.000000e+00 : f32
    %103 = vector.broadcast %cst_30 : f32 to vector<64x128xf32>
    %104 = arith.cmpf ogt, %102, %103 : vector<64x128xf32>
    %cst_31 = arith.constant 2.000000e-01 : f32
    %105 = vector.broadcast %cst_31 : f32 to vector<64x128xf32>
    %106 = arith.mulf %105, %102 : vector<64x128xf32>
    %107 = arith.select %104, %102, %106 : vector<64x128xi1>, vector<64x128xf32>
    %c0_32 = arith.constant 0 : index
    %c0_33 = arith.constant 0 : index
    %c0_34 = arith.constant 0 : index
    %108 = vector.load %arg6[%c0_32, %c0_33, %c0_34] : memref<1x64x128xf32, #tpu.memory_space<vmem>>, vector<1x64x128xf32>
    %109 = vector.shape_cast %108 : vector<1x64x128xf32> to vector<64x128xf32>
    %110 = vector.shape_cast %107 : vector<64x128xf32> to vector<1x64x128xf32>
    tpu.vector_store %arg6[%c0_32, %c0_33, %c0_34], %110 {strides = array<i32>} : memref<1x64x128xf32, #tpu.memory_space<vmem>>, vector<1x64x128xf32>,
    return
  }
  func.func @transform_1(%arg0: i32, %arg1: i32) -> (i32, i32) {
    %c0_i32 = arith.constant 0 : i32
    %c0_i32_0 = arith.constant 0 : i32
    %c0_i32_1 = arith.constant 0 : i32
    return %c0_i32, %c0_i32_0 : i32, i32
  }
  func.func @transform_2(%arg0: i32, %arg1: i32) -> (i32, i32) {
    %c0_i32 = arith.constant 0 : i32
    %c0_i32_0 = arith.constant 0 : i32
    %c0_i32_1 = arith.constant 0 : i32
    return %c0_i32, %c0_i32_0 : i32, i32
  }
  func.func @transform_3(%arg0: i32, %arg1: i32) -> (i32, i32) {
    %c0_i32 = arith.constant 0 : i32
    %c0_i32_0 = arith.constant 0 : i32
    %c0_i32_1 = arith.constant 0 : i32
    return %c0_i32, %c0_i32_0 : i32, i32
  }
  func.func @transform_4(%arg0: i32, %arg1: i32) -> (i32, i32, i32) {
    %c0_i32 = arith.constant 0 : i32
    %c0_i32_0 = arith.constant 0 : i32
    return %arg0, %arg1, %c0_i32 : i32, i32, i32
  }
}

</mosaic_0001>

<bundles_post_ra>
// kernel: tpu_custom_call.1
= control target key start
LH: loop header
LB: loop body
LE: loop exit
PB: predicated region body
PF: predicated region fallthrough
CT: control target
= control target key end

     0   :  { %9 = vsyncpa [#allocation5], 0  ;;  %s3054_s0 = inlined_call_operand.vmem [shape: f32[2,260,128], index: 0, kind: input, shape index: {}]   ;;  %s3055_s1 = inlined_call_operand.vmem [shape: f32[384,128], index: 1, kind: input, shape index: {}]   ;;  %s3056_s2 = inlined_call_operand.vmem [shape: f32[384,128], index: 2, kind: input, shape index: {}]   ;;  %s3057_s3 = inlined_call_operand.vmem [shape: f32[6,128], index: 3, kind: input, shape index: {}]   ;;  %s3058_s4 = inlined_call_operand.hbm [shape: f32[2,200,128], index: 4, kind: output, shape index: {}]  }
   0x1   :  { %11 = vsyncpa [#allocation5 + $0x1], 0  ;;  %s2203_s15 = smov 0   ;;  %s2205_s16 = smov 0  }
   0x2   :  { %s2207_s17 = smov 0   ;;  %s2209_s18 = smov 0  }
   0x3   :  { %s2211_s19 = smov 0   ;;  %s2213_s20 = smov 0  }
   0x4   :  { %s2215_s21 = smov 0   ;;  %s2217_s22 = smov 0  }
   0x5 LB: > { %s1532_s23 = sadd.s32 4294967295, %s2170_s22   ;;  %s1533_s24 = sadd.s32 4294967294, %s2170_s22   ;;  %s2170_s22 = sphi %s2217_s22, %s17_s22   ;;  %s2166_s21 = sphi %s2215_s21, %s3086_s21   ;;  %s2162_s20 = sphi %s2213_s20, %s3085_s20   ;;  %s2158_s19 = sphi %s2211_s19, %s3084_s19   ;;  %s2154_s18 = sphi %s2209_s18, %s3083_s18   ;;  %s2150_s17 = sphi %s2207_s17, %s3082_s17   ;;  %s2146_s16 = sphi %s2205_s16, %s3081_s16   ;;  %s2142_s15 = sphi %s2203_s15, %s3080_s15  }
   0x6   : > { %s26_s25 = sadd.s32 1, %s2162_s20  ;;  %s29_s26 = sadd.s32 1, %s2166_s21 }
   0x7   : > { %p27_p0 = scmp.ge.s32.totalorder %s26_s25, 4  ;;  %p111_p1 = scmp.ne.s32.totalorder %s2150_s17, %s2146_s16 }
   0x8   : > { %p112_p2 = scmp.eq.s32.totalorder %s1532_s23, 7  ;;  %p117_p5 = scmp.ne.s32.totalorder %s2146_s16, %s2142_s15 }
   0x9   : > { %s3088_s25 = smov (%p27_p0, %s26_s25), 0  ;;  %s3090_s26 = smov (!%p27_p0, %s29_s26), %s2166_s21 }
   0xa   : > { %s97_s27 = ssub.s32 %s2162_s20, %s3088_s25  ;;  %p2254_p3 = por %p112_p2, %p111_p1 }
   0xb   : > { %p31_p4 = scmp.ge.s32.totalorder %s3090_s26, 2  ;;  %p118_p6 = scmp.eq.s32.totalorder %s1533_s24, 7 }
   0xc   : > { %p1535_p7 = scmp.ge.s32.totalorder %s2170_s22, 1  ;;  %p145_p9 = scmp.lt.s32.totalorder %s2170_s22, 9 }
   0xd   : > { %s3092_s26 = smov (%p31_p4, %s3090_s26), 0  ;;  %p2263_p8 = por %p118_p6, %p117_p5 }
   0xe   : > { %s96_s30 = ssub.s32 %s2166_s21, %s3092_s26  ;;  %s101_s5 = sadd.s32 1, %s2150_s17 }
   0xf   : > { %s98_s6 = sor.u32 %s97_s27, %s96_s30  ;;  %p146_p10 = pnand %p1535_p7, %p145_p9 }
  0x10   : > { %p99_p11 = scmp.eq.s32.totalorder %s98_s6, 0  ;;  %s3059_s8 = sand.u32 (!%p146_p10), 1, %s2146_s16  }
  0x11   : > { %149 = sbr.rel (%p146_p10) target bundleno = 1228 (0x4cc), region = 32  ;;  %s2276_s9 = sand.u32 (!%p146_p10), 1, %s2154_s18 }
  0x12   : > { %s2272_s7 = scalar_select %p99_p11, %s2150_s17, %s101_s5  }
  0x13   : > { %s1536_s10 = sshll.u32 (!%p146_p10), %s3059_s8, 6  ;;  %p1537_p12 = scmp.ne.s32.totalorder (!%p146_p10), %s2154_s18, 0 }
  0x14   : > { %s2280_s11 = scalar_lea.vmem (!%p146_p10), [#allocation4], %s1536_s10 }
  0x18   : > { %173 = sbr.rel (%p1537_p12) target bundleno = 36 (0x24), region = 36  ;;  %s1538_s12 = sshll.u32 (!%p1537_p12), %s2154_s18, 6 }
  0x19   : > { %s175_s13 = smul.u32 (!%p1537_p12), 264, %s2158_s19  ;;  %s180_s6 = scalar_lea.sflag (!%p1537_p12), [#allocation3], %s2276_s9 }
  0x1a   : > { %s178_s14 = smul.u32 (!%p1537_p12), 72, %s2276_s9 }
  0x1b   : > { %s176_s23 = sadd.s32 (!%p1537_p12), %s1538_s12, %s175_s13 }
  0x1c   : > { %s177_s30 = scalar_lea.vmem (!%p1537_p12), %s3054_s0, %s176_s23  ;;  %s179_s5 = scalar_lea.vmem (!%p1537_p12), [#allocation2], %s178_s14 }
  0x1d   : > { %v218_v0 = vld [vmem:[%s177_s30] sm:$0xff] (!%p1537_p12)  ;;  %v220_v1 = vld [vmem:[%s177_s30 + $0x8] sm:$0xff] (!%p1537_p12)  ;;  %v222_v2 = vld [vmem:[%s177_s30 + $0x10] sm:$0xff] (!%p1537_p12) }
  0x1e   : > { %219 = vst [vmem:[%s179_s5] sm:$0xff] (!%p1537_p12), %v218_v0  ;;  %221 = vst [vmem:[%s179_s5 + $0x8] sm:$0xff] (!%p1537_p12), %v220_v1  ;;  %v224_v3 = vld [vmem:[%s177_s30 + $0x18] sm:$0xff] (!%p1537_p12)  ;;  %v226_v4 = vld [vmem:[%s177_s30 + $0x20] sm:$0xff] (!%p1537_p12) }
  0x1f   : > { %223 = vst [vmem:[%s179_s5 + $0x10] sm:$0xff] %v222_v2  ;;  %v228_v5 = vld [vmem:[%s177_s30 + $0x28] sm:$0xff]  ;;  %225 = vst [vmem:[%s179_s5 + $0x18] sm:$0xff] %v224_v3  ;;  %v230_v6 = vld [vmem:[%s177_s30 + $0x30] sm:$0xff] }
  0x20   : > { %227 = vst [vmem:[%s179_s5 + $0x20] sm:$0xff] %v226_v4  ;;  %229 = vst [vmem:[%s179_s5 + $0x28] sm:$0xff] %v228_v5  ;;  %v232_v7 = vld [vmem:[%s177_s30 + $0x38] sm:$0xff]  ;;  %v1539_v8 = vld [vmem:[%s177_s30 + $0x40] sm:$0xf] }
  0x21   : > { %231 = vst [vmem:[%s179_s5 + $0x30] sm:$0xff] %v230_v6  ;;  %233 = vst [vmem:[%s179_s5 + $0x38] sm:$0xff] %v232_v7 }
  0x22   : > { %1540 = vst [vmem:[%s179_s5 + $0x40] sm:$0xf] %v1539_v8 }
  0x23   : > { %248 = vsyncadd %s180_s6, 1088 }
  0x24 PF: > { %s249_s10 = sadd.s32 1, %s2154_s18 }
  0x25   : > { %p1541_p13 = scmp.ge.s32.totalorder %s249_s10, 4 }
  0x26   : > { %s254_s12 = sand.u32 (!%p1541_p13), 1, %s249_s10  ;;  %s1542_s13 = sshll.u32 (!%p1541_p13), %s2154_s18, 6 }
  0x27   : > { %253 = sbr.rel (%p1541_p13) target bundleno = 51 (0x33), region = 77  ;;  %s261_s8 = scalar_lea.sflag (!%p1541_p13), [#allocation3], %s254_s12 }
  0x28   : > { %s1458_s14 = smul.u32 (!%p1541_p13), 264, %s2158_s19 }
  0x29   : > { %s259_s23 = smul.u32 (!%p1541_p13), 72, %s254_s12 }
  0x2a   : > { %s1459_s24 = sadd.s32 (!%p1541_p13), %s1542_s13, %s1458_s14 }
  0x2b   : > { %s1460_s30 = scalar_lea.vmem (!%p1541_p13), %s3054_s0, %s1459_s24  ;;  %s260_s5 = scalar_lea.vmem (!%p1541_p13), [#allocation2], %s259_s23 }
  0x2c   : > { %v1544_v9 = vld [vmem:[%s1460_s30 + $0x40] sm:$0xff] (!%p1541_p13)  ;;  %v1545_v10 = vld [vmem:[%s1460_s30 + $0x48] sm:$0xff] (!%p1541_p13)  ;;  %v1546_v11 = vld [vmem:[%s1460_s30 + $0x50] sm:$0xff] (!%p1541_p13) }
  0x2d   : > { %300 = vst [vmem:[%s260_s5] sm:$0xff] (!%p1541_p13), %v1544_v9  ;;  %302 = vst [vmem:[%s260_s5 + $0x8] sm:$0xff] (!%p1541_p13), %v1545_v10  ;;  %v1547_v12 = vld [vmem:[%s1460_s30 + $0x58] sm:$0xff] (!%p1541_p13)  ;;  %v1548_v13 = vld [vmem:[%s1460_s30 + $0x60] sm:$0xff] (!%p1541_p13) }
  0x2e   : > { %304 = vst [vmem:[%s260_s5 + $0x10] sm:$0xff] %v1546_v11  ;;  %v1549_v14 = vld [vmem:[%s1460_s30 + $0x68] sm:$0xff]  ;;  %306 = vst [vmem:[%s260_s5 + $0x18] sm:$0xff] %v1547_v12  ;;  %v1550_v15 = vld [vmem:[%s1460_s30 + $0x70] sm:$0xff] }
  0x2f   : > { %308 = vst [vmem:[%s260_s5 + $0x20] sm:$0xff] %v1548_v13  ;;  %310 = vst [vmem:[%s260_s5 + $0x28] sm:$0xff] %v1549_v14  ;;  %v1551_v16 = vld [vmem:[%s1460_s30 + $0x78] sm:$0xff]  ;;  %v1552_v17 = vld [vmem:[%s1460_s30 + $0x80] sm:$0xf] }
  0x30   : > { %312 = vst [vmem:[%s260_s5 + $0x30] sm:$0xff] %v1550_v15  ;;  %314 = vst [vmem:[%s260_s5 + $0x38] sm:$0xff] %v1551_v16 }
  0x31   : > { %1553 = vst [vmem:[%s260_s5 + $0x40] sm:$0xf] %v1552_v17 }
  0x32   : > { %329 = vsyncadd %s261_s8, 1088 }
  0x33 PF: > { %s331_s10 = smul.u32 72, %s2276_s9  ;;  %s333_s14 = scalar_lea.sflag [#allocation3], %s2276_s9 }
  0x35   : > { %s2298_s13 = scalar_lea.vmem [#allocation2], %s331_s10 }
  0x36   : > { %2134 = dma.done.wait %s333_s14, 1088 }
  0x37   : > { %2135 = vsyncadd %s333_s14, 4294966208  ;;  %v2172_v18 = vmov 0.0|0.0   ;;  %vm2173_vm0 = vmmov 0   ;;  %v2174_v19 = vmov 0.0   ;;  %v426_v20 = vld [vmem:[%s3055_s1 + $0x80] sm:$0xff]  ;;  %v427_v21 = vld [vmem:[%s3055_s1 + $0x88] sm:$0xff] }
  0x38   : > { %1875 = vmatprep.subr.bf16.mxu1 %v2172_v18  ;;  %1772 = vmatprep.mubr.msk.f32.mxu1 %vm2173_vm0, %v2174_v19  ;;  %v410_v22 = vld [vmem:[%s3055_s1] sm:$0xff]  ;;  %v1843_v23 = vpack.c.bf16 %v427_v21, %v426_v20  ;;  %v411_v24 = vld [vmem:[%s3055_s1 + $0x8] sm:$0xff]  ;;  %v428_v25 = vld [vmem:[%s3055_s1 + $0x90] sm:$0xff]  ;;  %vm356_vm1 = vcmask 1046528   ;;  %vm383_vm2 = vcmask 1045504   ;;  %vm698_vm3 = vcmask 1041408  }
  0x39   : > { %v429_v26 = vld [vmem:[%s3055_s1 + $0x98] sm:$0xff]  ;;  %v1845_v27 = vpack.c.bf16 %v411_v24, %v410_v22  ;;  %v412_v29 = vld [vmem:[%s3055_s1 + $0x10] sm:$0xff]  ;;  %v442_v31 = vld [vmem:[%s3055_s1 + $0x100] sm:$0xff]  ;;  %s3062_s6 = sshll.u32 %s2154_s18, 6  ;;  %s3079_s24 = sand.u32 1, %s2146_s16  }
  0x3a   : > { %v1847_v28 = vpack.c.bf16 %v429_v26, %v428_v25  ;;  %v413_v30 = vld [vmem:[%s3055_s1 + $0x18] sm:$0xff]  ;;  %1844 = vmatprep.subr.bf16.mxu0 %v1843_v23  ;;  %v443_v32 = vld [vmem:[%s3055_s1 + $0x108] sm:$0xff]  ;;  %v430_v33 = vld [vmem:[%s3055_s1 + $0xa0] sm:$0xff]  ;;  %s1556_s14 = sadd.s32 4294967295, %s3062_s6  ;;  %s2982_s27 = scalar_lea.sflag [#allocation5], %s3079_s24 }
  0x3b   : > { %v431_v34 = vld [vmem:[%s3055_s1 + $0xa8] sm:$0xff]  ;;  %1846 = vmatpush3.bf16.msra.mxu0 %v1845_v27  ;;  %v1849_v35 = vpack.c.bf16 %v413_v30, %v412_v29  ;;  %v1876_v36 = vpack.c.bf16 %v443_v32, %v442_v31  ;;  %v444_v37 = vld [vmem:[%s3055_s1 + $0x110] sm:$0xff]  ;;  %v414_v39 = vld [vmem:[%s3055_s1 + $0x20] sm:$0xff]  ;;  %s1566_s30 = sshll.u32 (%p2254_p3), %s2154_s18, 3 }
  0x3c   : > { %1848 = vmatprep.subr.bf16.mxu0 %v1847_v28  ;;  %v1851_v38 = vpack.c.bf16 %v431_v34, %v430_v33  ;;  %v415_v40 = vld [vmem:[%s3055_s1 + $0x28] sm:$0xff]  ;;  %v445_v41 = vld [vmem:[%s3055_s1 + $0x118] sm:$0xff]  ;;  %v432_v43 = vld [vmem:[%s3055_s1 + $0xb0] sm:$0xff]  ;;  %s1395_s9 = ssub.s32 (%p2254_p3), 25, %s1566_s30 }
  0x3d   : > { %1877 = vmatpush3.bf16.msra.mxu1 %v1876_v36  ;;  %v1879_v42 = vpack.c.bf16 %v445_v41, %v444_v37  ;;  %v433_v44 = vld [vmem:[%s3055_s1 + $0xb8] sm:$0xff]  ;;  %v446_v45 = vld [vmem:[%s3055_s1 + $0x120] sm:$0xff]  ;;  %v447_v46 = vld [vmem:[%s3055_s1 + $0x128] sm:$0xff]  ;;  %v1853_v47 = vpack.c.bf16 %v415_v40, %v414_v39  ;;  %p1396_p0 = scmp.lt.s32.totalorder (%p2254_p3), %s1395_s9, 8 }
  0x3e   : > { %1878 = vmatprep.subr.bf16.mxu1 %v2172_v18  ;;  %v1855_v48 = vpack.c.bf16 %v433_v44, %v432_v43  ;;  %v416_v49 = vld [vmem:[%s3055_s1 + $0x30] sm:$0xff]  ;;  %v417_v50 = vld [vmem:[%s3055_s1 + $0x38] sm:$0xff]  ;;  %v1882_v51 = vpack.c.bf16 %v447_v46, %v446_v45  ;;  %v434_v52 = vld [vmem:[%s3055_s1 + $0xc0] sm:$0xff] }
  0x3f   : > { %1850 = vmatpush3.bf16.msra.mxu0 %v1849_v35  ;;  %v435_v53 = vld [vmem:[%s3055_s1 + $0xc8] sm:$0xff]  ;;  %v448_v54 = vld [vmem:[%s3055_s1 + $0x130] sm:$0xff]  ;;  %v449_v55 = vld [vmem:[%s3055_s1 + $0x138] sm:$0xff]  ;;  %v1857_v56 = vpack.c.bf16 %v417_v50, %v416_v49 }
  0x40   : > { %1852 = vmatprep.subr.bf16.mxu0 %v1851_v38  ;;  %v1859_v57 = vpack.c.bf16 %v435_v53, %v434_v52  ;;  %v418_v58 = vld [vmem:[%s3055_s1 + $0x40] sm:$0xff]  ;;  %v419_v59 = vld [vmem:[%s3055_s1 + $0x48] sm:$0xff]  ;;  %v1885_v60 = vpack.c.bf16 %v449_v55, %v448_v54  ;;  %v436_v61 = vld [vmem:[%s3055_s1 + $0xd0] sm:$0xff] }
  0x41   : > { %1880 = vmatpush3.bf16.msra.mxu1 %v1879_v42  ;;  %v437_v62 = vld [vmem:[%s3055_s1 + $0xd8] sm:$0xff]  ;;  %v450_v63 = vld [vmem:[%s3055_s1 + $0x140] sm:$0xff]  ;;  %v451_v0 = vld [vmem:[%s3055_s1 + $0x148] sm:$0xff]  ;;  %v1861_v3 = vpack.c.bf16 %v419_v59, %v418_v58 }
  0x42   : > { %1881 = vmatprep.subr.bf16.mxu1 %v2172_v18  ;;  %v337_v1 = vld [vmem:[%s2298_s13] sm:$0xff]  ;;  %v2405_v2 = vld [vmem:[%s2298_s13 + $0x8] sm:$0xff]  ;;  %v1863_v6 = vpack.c.bf16 %v437_v62, %v436_v61  ;;  %v1888_v9 = vpack.c.bf16 %v451_v0, %v450_v63  ;;  %v439_v11 = vld [vmem:[%s3055_s1 + $0xe8] sm:$0xff] }
  0x43   : > { %1854 = vmatpush3.bf16.msra.mxu0 %v1853_v47  ;;  %v357_v4 = vrot.slane %v337_v1, 1  ;;  %v358_v5 = vrot.slane %v2405_v2, 1  ;;  %v420_v7 = vld [vmem:[%s3055_s1 + $0x50] sm:$0xff]  ;;  %v421_v8 = vld [vmem:[%s3055_s1 + $0x58] sm:$0xff]  ;;  %v438_v10 = vld [vmem:[%s3055_s1 + $0xe0] sm:$0xff]  ;;  %v384_v37 = vrot.slane %v337_v1, 2 }
  0x44   : > { %1856 = vmatprep.subr.bf16.mxu0 %v1855_v48  ;;  %v452_v13 = vld [vmem:[%s3055_s1 + $0x150] sm:$0xff]  ;;  %v453_v14 = vld [vmem:[%s3055_s1 + $0x158] sm:$0xff]  ;;  %v1865_v15 = vpack.c.bf16 %v421_v8, %v420_v7  ;;  %v1867_v16 = vpack.c.bf16 %v439_v11, %v438_v10  ;;  %v422_v17 = vld [vmem:[%s3055_s1 + $0x60] sm:$0xff]  ;;  %v385_v38 = vrot.slane %v2405_v2, 2  ;;  %v458_v8 = vlaneseq }
  0x45   : > { %1883 = vmatpush3.bf16.msra.mxu1 %v1882_v51  ;;  %v359_v12 = vsel %vm356_vm1, %v357_v4, %v358_v5  ;;  %v423_v20 = vld [vmem:[%s3055_s1 + $0x68] sm:$0xff]  ;;  %v1891_v21 = vpack.c.bf16 %v453_v14, %v452_v13  ;;  %v440_v22 = vld [vmem:[%s3055_s1 + $0xf0] sm:$0xff]  ;;  %v441_v23 = vld [vmem:[%s3055_s1 + $0xf8] sm:$0xff] }
  0x46   : > { %1884 = vmatprep.subr.bf16.mxu1 %v2172_v18  ;;  %526 = vmatprep.mubr.f32.mxu0 %v359_v12  ;;  %v454_v24 = vld [vmem:[%s3055_s1 + $0x160] sm:$0xff]  ;;  %v455_v25 = vld [vmem:[%s3055_s1 + $0x168] sm:$0xff]  ;;  %v1869_v26 = vpack.c.bf16 %v423_v20, %v422_v17  ;;  %v1871_v27 = vpack.c.bf16 %v441_v23, %v440_v22  ;;  %v424_v28 = vld [vmem:[%s3055_s1 + $0x70] sm:$0xff]  ;;  %v2466_v42 = vsel %vm383_vm2, %v384_v37, %v385_v38 }
  0x47   : > { %1858 = vmatpush3.bf16.msra.mxu0 %v1857_v56  ;;  %v425_v29 = vld [vmem:[%s3055_s1 + $0x78] sm:$0xff]  ;;  %v1894_v30 = vpack.c.bf16 %v455_v25, %v454_v24  ;;  %v339_v31 = vld [vmem:[%s2298_s13 + $0x10] sm:$0xff]  ;;  %v456_v32 = vld [vmem:[%s3055_s1 + $0x170] sm:$0xff] }
  0x48   : > { %1860 = vmatprep.subr.bf16.mxu0 %v1859_v57  ;;  %v457_v33 = vld [vmem:[%s3055_s1 + $0x178] sm:$0xff]  ;;  %v1873_v34 = vpack.c.bf16 %v425_v29, %v424_v28  ;;  %v360_v35 = vrot.slane %v339_v31, 1  ;;  %v340_v39 = vld [vmem:[%s2298_s13 + $0x18] sm:$0xff]  ;;  %v387_v43 = vrot.slane %v339_v31, 2  ;;  %v343_v53 = vld [vmem:[%s2298_s13 + $0x30] sm:$0xff] }
  0x49   : > { %1886 = vmatpush3.bf16.msra.mxu1 %v1885_v60  ;;  %v1897_v36 = vpack.c.bf16 %v457_v33, %v456_v32  ;;  %v362_v41 = vrot.slane %v340_v39, 1  ;;  %v341_v44 = vld [vmem:[%s2298_s13 + $0x20] sm:$0xff]  ;;  %v389_v47 = vrot.slane %v340_v39, 2  ;;  %v342_v48 = vld [vmem:[%s2298_s13 + $0x28] sm:$0xff]  ;;  %v368_v55 = vrot.slane %v343_v53, 1  ;;  %v344_v58 = vld [vmem:[%s2298_s13 + $0x38] sm:$0xff] }
  0x4a   : > { %1887 = vmatprep.subr.bf16.mxu1 %v2172_v18  ;;  %v361_v40 = vsel %vm356_vm1, %v358_v5, %v360_v35  ;;  %v2474_v46 = vsel %vm383_vm2, %v385_v38, %v387_v43  ;;  %v366_v50 = vrot.slane %v342_v48, 1  ;;  %v391_v52 = vrot.slane %v341_v44, 2  ;;  %v345_v63 = vld [vmem:[%s2298_s13 + $0x40] sm:$0xf]  ;;  %v2531_v11 = vld [vmem:[%s3057_s3] sm:$0x3f] }
  0x4b   : > { %1862 = vmatpush3.bf16.msra.mxu0 %v1861_v3  ;;  %v363_v45 = vsel %vm356_vm1, %v360_v35, %v362_v41  ;;  %v2483_v51 = vsel %vm383_vm2, %v387_v43, %v389_v47  ;;  %v393_v57 = vrot.slane %v342_v48, 2  ;;  %v370_v60 = vrot.slane %v344_v58, 1 }
  0x4c   : > { %1864 = vmatprep.subr.bf16.mxu0 %v1863_v6  ;;  %v2491_v56 = vsel %vm383_vm2, %v389_v47, %v391_v52  ;;  %v369_v59 = vsel %vm356_vm1, %v366_v50, %v368_v55  ;;  %v395_v62 = vrot.slane %v343_v53, 2  ;;  %v397_v3 = vrot.slane %v344_v58, 2 }
  0x4d   : > { %1889 = vmatpush3.bf16.msra.mxu1 %v1888_v9  ;;  %v2499_v61 = vsel %vm383_vm2, %v391_v52, %v393_v57  ;;  %v371_v0 = vsel %vm356_vm1, %v368_v55, %v370_v60  ;;  %v399_v6 = vrot.slane %v345_v63, 2  ;;  %v2525_v9 = vshrl.u32 %v458_v8, 7 }
  0x4e   : > { %1890 = vmatprep.subr.bf16.mxu1 %v2172_v18  ;;  %v2514_v5 = vsel %vm383_vm2, %v395_v62, %v397_v3 }
  0x4f   : > { %1866 = vmatpush3.bf16.msra.mxu0 %v1865_v15  ;;  %v2520_v7 = vsel %vm383_vm2, %v397_v3, %v399_v6  ;;  %v460_v10 = vsub.s32 0, %v2525_v9 }
  0x50   : > { %1868 = vmatprep.subr.bf16.mxu0 %v1867_v16 }
  0x51   : > { %1892 = vmatpush3.bf16.msra.mxu1 %v1891_v21  ;;  %v2534_v13 = vrot.slane %v2531_v11, %v460_v10 }
  0x52   : > { %1893 = vmatprep.subr.bf16.mxu1 %v2172_v18 }
  0x53   : > { %1870 = vmatpush3.bf16.msra.mxu0 %v1869_v26 }
  0x54   : > { %1872 = vmatprep.subr.bf16.mxu0 %v1871_v27 }
  0x55   : > { %1895 = vmatpush3.bf16.msra.mxu1 %v1894_v30 }
  0x56   : > { %1896 = vmatprep.subr.bf16.mxu1 %v2172_v18  ;;  %v364_v18 = vrot.slane %v341_v44, 1 }
  0x57   : > { %1874 = vmatpush3.bf16.msra.mxu0 %v1873_v34 }
  0x58   : > { %v365_v49 = vsel %vm356_vm1, %v362_v41, %v364_v18  ;;  %v367_v54 = vsel %vm356_vm1, %v364_v18, %v366_v50 }
  0x59   : > { %1898 = vmatpush3.bf16.msra.mxu1 %v1897_v36 }
  0x5a   : > { %527 = vmatmul.mubr.f32.vlgmr.msra.gmra.mrb[0].mxu0 %v337_v1  ;;  %v372_v1 = vrot.slane %v345_v63, 1 }
  0x5b   : > { %531 = vmatprep.mubr.f32.mxu0 %v361_v40 }
  0x5c   : > { %1773 = vmatmul.mubr.f32.vlgmr.msra.gmra.mrb[0].mxu1 %v2466_v42  ;;  %v373_v4 = vsel %vm356_vm1, %v370_v60, %v372_v1 }
  0x5d   : > { %1775 = vmatprep.mubr.msk.f32.mxu1 %vm2173_vm0, %v2174_v19 }
  0x5e   : > { %532 = vmatmul.mubr.f32.gmra.mrb[2].mxu0 %v2405_v2  ;;  %v2507_v2 = vsel %vm383_vm2, %v393_v57, %v395_v62 }
  0x5f   : > { %536 = vmatprep.mubr.f32.mxu0 %v363_v45 }
  0x60   : > { %1776 = vmatmul.mubr.f32.gmra.mrb[2].mxu1 %v2474_v46 }
  0x61   : > { %1778 = vmatprep.mubr.msk.f32.mxu1 %vm2173_vm0, %v2174_v19 }
  0x62   : > { %537 = vmatmul.mubr.f32.gmra.mrb[4].mxu0 %v339_v31 }
  0x63   : > { %541 = vmatprep.mubr.f32.mxu0 %v365_v49 }
  0x64   : > { %1779 = vmatmul.mubr.f32.gmra.mrb[4].mxu1 %v2483_v51 }
  0x65   : > { %1781 = vmatprep.mubr.msk.f32.mxu1 %vm2173_vm0, %v2174_v19 }
  0x66   : > { %542 = vmatmul.mubr.f32.gmra.mrb[6].mxu0 %v340_v39 }
  0x67   : > { %546 = vmatprep.mubr.f32.mxu0 %v367_v54 }
  0x68   : > { %1782 = vmatmul.mubr.f32.gmra.mrb[6].mxu1 %v2491_v56 }
  0x69   : > { %1784 = vmatprep.mubr.msk.f32.mxu1 %vm2173_vm0, %v2174_v19 }
  0x6a   : > { %547 = vmatmul.mubr.f32.gmra.mrb[8].mxu0 %v341_v44 }
  0x6b   : > { %551 = vmatprep.mubr.f32.mxu0 %v369_v59 }
  0x6c   : > { %1785 = vmatmul.mubr.f32.gmra.mrb[8].mxu1 %v2499_v61 }
  0x6d   : > { %1787 = vmatprep.mubr.msk.f32.mxu1 %vm2173_vm0, %v2174_v19 }
  0x6e   : > { %552 = vmatmul.mubr.f32.gmra.mrb[10].mxu0 %v342_v48 }
  0x6f   : > { %556 = vmatprep.mubr.f32.mxu0 %v371_v0 }
  0x70   : > { %1788 = vmatmul.mubr.f32.gmra.mrb[10].mxu1 %v2507_v2 }
  0x71   : > { %1790 = vmatprep.mubr.msk.f32.mxu1 %vm2173_vm0, %v2174_v19 }
  0x72   : > { %557 = vmatmul.mubr.f32.gmra.mrb[12].mxu0 %v343_v53 }
  0x73   : > { %561 = vmatprep.mubr.f32.mxu0 %v373_v4 }
  0x74   : > { %1791 = vmatmul.mubr.f32.gmra.mrb[12].mxu1 %v2514_v5 }
  0x75   : > { %1793 = vmatprep.mubr.msk.f32.mxu1 %vm2173_vm0, %v2174_v19 }
  0x76   : > { %562 = vmatmul.mubr.f32.gmra.mrb[14].mxu0 %v344_v58 }
  0x77   : > { %566 = vmatprep.mubr.f32.mxu0 %v372_v1 }
  0x78   : > { %1794 = vmatmul.mubr.f32.gmra.mrb[14].mxu1 %v2520_v7 }
  0x79   : > { %1796 = vmatprep.mubr.msk.f32.mxu1 %vm2173_vm0, %v2174_v19 }
  0x7a   : > { %567 = vmatmul.mubr.f32.gmra.mrb[16].mxu0 %v345_v63 }
  0x7c   : > { %1797 = vmatmul.mubr.f32.gmra.mrb[16].mxu1 %v399_v6 }
 0x12d   : > { %v1608_v12 = vpop.f32.mrb[0].mxu0 }
 0x12e   : > { %v1609_v14 = vpop.f32.mrb[1].mxu0 }
 0x12f   : > { %v1610_v15 = vadd.f32 %v1609_v14, %v1608_v12  ;;  %v638_v16 = vpop.f32.mrb[0].mxu1 }
 0x130   : > { %v1774_v19 = vpop.f32.mrb[1].mxu1 }
 0x131   : > { %v1611_v17 = vpop.f32.mrb[2].mxu0  ;;  %v529_v20 = vadd.f32 %v1610_v15, %v2534_v13 }
 0x132   : > { %v1612_v21 = vpop.f32.mrb[3].mxu0 }
 0x133   : > { %v2537_v22 = vadd.f32 %v638_v16, %v529_v20  ;;  %v1613_v23 = vadd.f32 %v1612_v21, %v1611_v17  ;;  %v643_v24 = vpop.f32.mrb[2].mxu1 }
 0x134   : > { %v1777_v25 = vpop.f32.mrb[3].mxu1 }
 0x135   : > { %v1614_v26 = vpop.f32.mrb[4].mxu0  ;;  %v534_v27 = vadd.f32 %v1613_v23, %v2534_v13  ;;  %682 = vadd.xlane.f32.xlu0 %v2537_v22 }
 0x136   : > { %v1615_v28 = vpop.f32.mrb[5].mxu0 }
 0x137   : > { %v2541_v29 = vadd.f32 %v643_v24, %v534_v27  ;;  %v1616_v30 = vadd.f32 %v1615_v28, %v1614_v26  ;;  %v648_v31 = vpop.f32.mrb[4].mxu1  ;;  %v988_v26 = vld [vmem:[%s3056_s2 + $0x80] sm:$0xff]  ;;  %v989_v27 = vld [vmem:[%s3056_s2 + $0x88] sm:$0xff] }
 0x138   : > { %v1780_v32 = vpop.f32.mrb[5].mxu1  ;;  %v1899_v28 = vpack.c.bf16 %v989_v27, %v988_v26 }
 0x139   : > { %v1617_v33 = vpop.f32.mrb[6].mxu0  ;;  %v539_v34 = vadd.f32 %v1616_v30, %v2534_v13  ;;  %684 = vadd.xlane.f32.xlu0 %v2541_v29  ;;  %v973_v30 = vld [vmem:[%s3056_s2 + $0x8] sm:$0xff] }
 0x13a   : > { %v1618_v35 = vpop.f32.mrb[7].mxu0  ;;  %1900 = vmatprep.subr.bf16.mxu0 %v1899_v28  ;;  %v1009_v28 = vld [vmem:[%s3056_s2 + $0x128] sm:$0xff] }
 0x13b   : > { %v2545_v36 = vadd.f32 %v648_v31, %v539_v34  ;;  %v1619_v37 = vadd.f32 %v1618_v35, %v1617_v33  ;;  %v653_v38 = vpop.f32.mrb[6].mxu1 }
 0x13c   : > { %v1783_v39 = vpop.f32.mrb[7].mxu1 }
 0x13d   : > { %v1620_v40 = vpop.f32.mrb[8].mxu0  ;;  %v544_v41 = vadd.f32 %v1619_v37, %v2534_v13  ;;  %686 = vadd.xlane.f32.xlu1 %v2545_v36 }
 0x13e   : > { %v1621_v43 = vpop.f32.mrb[9].mxu0 }
 0x13f   : > { %v2549_v44 = vadd.f32 %v653_v38, %v544_v41  ;;  %v1622_v45 = vadd.f32 %v1621_v43, %v1620_v40  ;;  %v658_v18 = vpop.f32.mrb[8].mxu1 }
 0x140   : > { %v1786_v47 = vpop.f32.mrb[9].mxu1 }
 0x141   : > { %v1623_v48 = vpop.f32.mrb[10].mxu0  ;;  %v549_v49 = vadd.f32 %v1622_v45, %v2534_v13  ;;  %688 = vadd.xlane.f32.xlu1 %v2549_v44 }
 0x142   : > { %v1624_v50 = vpop.f32.mrb[11].mxu0 }
 0x143   : > { %v2553_v52 = vadd.f32 %v658_v18, %v549_v49  ;;  %v1625_v53 = vadd.f32 %v1624_v50, %v1623_v48  ;;  %v663_v54 = vpop.f32.mrb[10].mxu1 }
 0x144   : > { %v1789_v55 = vpop.f32.mrb[11].mxu1 }
 0x145   : > { %v1626_v57 = vpop.f32.mrb[12].mxu0  ;;  %v554_v58 = vadd.f32 %v1625_v53, %v2534_v13  ;;  %690 = vadd.xlane.f32.xlu0 %v2553_v52 }
 0x146   : > { %v1627_v59 = vpop.f32.mrb[13].mxu0 }
 0x147   : > { %v664_v60 = vadd.f32 %v663_v54, %v554_v58  ;;  %v1628_v62 = vadd.f32 %v1627_v59, %v1626_v57  ;;  %v668_v63 = vpop.f32.mrb[12].mxu1  ;;  %v1005_v57 = vld [vmem:[%s3056_s2 + $0x108] sm:$0xff]  ;;  %v991_v59 = vld [vmem:[%s3056_s2 + $0x98] sm:$0xff] }
 0x148   : > { %v1792_v0 = vpop.f32.mrb[13].mxu1 }
 0x149   : > { %v1629_v1 = vpop.f32.mrb[14].mxu0  ;;  %v559_v3 = vadd.f32 %v1628_v62, %v2534_v13  ;;  %692 = vadd.xlane.f32.xlu1 %v664_v60 }
 0x14a   : > { %v1630_v4 = vpop.f32.mrb[15].mxu0 }
 0x14b   : > { %v2558_v6 = vadd.f32 %v668_v63, %v559_v3  ;;  %v1631_v8 = vadd.f32 %v1630_v4, %v1629_v1  ;;  %v673_v10 = vpop.f32.mrb[14].mxu1  ;;  %v974_v1 = vld [vmem:[%s3056_s2 + $0x10] sm:$0xff] }
 0x14c   : > { %v1795_v12 = vpop.f32.mrb[15].mxu1 }
 0x14d   : > { %v1632_v14 = vpop.f32.mrb[16].mxu0  ;;  %v564_v15 = vadd.f32 %v1631_v8, %v2534_v13  ;;  %694 = vadd.xlane.f32.xlu0 %v2558_v6  ;;  %v1007_v12 = vld [vmem:[%s3056_s2 + $0x118] sm:$0xff] }
 0x14e   : > { %v1633_v16 = vpop.f32.mrb[17].mxu0 }
 0x14f   : > { %v2562_v19 = vadd.f32 %v673_v10, %v564_v15  ;;  %v1634_v17 = vadd.f32 %v1633_v16, %v1632_v14  ;;  %v678_v20 = vpop.f32.mrb[16].mxu1  ;;  %v1006_v10 = vld [vmem:[%s3056_s2 + $0x110] sm:$0xff]  ;;  %v992_v15 = vld [vmem:[%s3056_s2 + $0xa0] sm:$0xff]  ;;  %v993_v16 = vld [vmem:[%s3056_s2 + $0xa8] sm:$0xff] }
 0x150   : > { %v1798_v21 = vpop.f32.mrb[17].mxu1 }
 0x151   : > { %v569_v23 = vadd.f32 %v1634_v17, %v2534_v13  ;;  %696 = vadd.xlane.f32.xlu1 %v2562_v19  ;;  %v972_v13 = vld [vmem:[%s3056_s2] sm:$0xff]  ;;  %v1935_v17 = vpack.c.bf16 %v1007_v12, %v1006_v10  ;;  %v1907_v21 = vpack.c.bf16 %v993_v16, %v992_v15  ;;  %v1015_v10 = vld [vmem:[%s3056_s2 + $0x158] sm:$0xff]  ;;  %v1001_v16 = vld [vmem:[%s3056_s2 + $0xe8] sm:$0xff] }
 0x152   : > { %v1901_v31 = vpack.c.bf16 %v973_v30, %v972_v13  ;;  %v1008_v13 = vld [vmem:[%s3056_s2 + $0x120] sm:$0xff] }
 0x153   : > { %v2566_v24 = vadd.f32 %v678_v20, %v569_v23  ;;  %v976_v23 = vld [vmem:[%s3056_s2 + $0x20] sm:$0xff] }
 0x154   : > { %1902 = vmatpush3.bf16.msra.mxu0 %v1901_v31  ;;  %v994_v31 = vld [vmem:[%s3056_s2 + $0xb0] sm:$0xff]  ;;  %v1000_v15 = vld [vmem:[%s3056_s2 + $0xe0] sm:$0xff] }
 0x155   : > { %v699_v25 = vsel %vm698_vm3, %v2566_v24, 0.0 }
 0x156   : > { %700 = vadd.xlane.f32.xlu0 %v699_v25 }
 0x1c2   : > { %v683_v32 = vpop.xlane.xlu0 %682 }
 0x1c3   : > { %v703_v33 = vmul.f32 0.0078125, %v683_v32  ;;  %v995_v32 = vld [vmem:[%s3056_s2 + $0xb8] sm:$0xff] }
 0x1c5   : > { %v2583_v34 = vsub.f32 %v2537_v22, %v703_v33  ;;  %v1939_v33 = vpack.c.bf16 %v1009_v28, %v1008_v13  ;;  %v1003_v13 = vld [vmem:[%s3056_s2 + $0xf8] sm:$0xff] }
 0x1c6   : > { %v685_v35 = vpop.xlane.xlu0 %684 }
 0x1c7   : > { %v704_v37 = vmul.f32 0.0078125, %v685_v35  ;;  %v721_v38 = vmul.f32 %v2583_v34, %v2583_v34  ;;  %v1911_v35 = vpack.c.bf16 %v995_v32, %v994_v31  ;;  %v986_v31 = vld [vmem:[%s3056_s2 + $0x70] sm:$0xff]  ;;  %v987_v32 = vld [vmem:[%s3056_s2 + $0x78] sm:$0xff] }
 0x1c9   : > { %v2588_v39 = vsub.f32 %v2541_v29, %v704_v37  ;;  %730 = vadd.xlane.f32.xlu1 %v721_v38  ;;  %v978_v37 = vld [vmem:[%s3056_s2 + $0x30] sm:$0xff] }
 0x1ca   : > { %v687_v40 = vpop.xlane.xlu1 %686 }
 0x1cb   : > { %v705_v41 = vmul.f32 0.0078125, %v687_v40  ;;  %v722_v43 = vmul.f32 %v2588_v39, %v2588_v39 }
 0x1cd   : > { %v2593_v45 = vsub.f32 %v2545_v36, %v705_v41  ;;  %732 = vadd.xlane.f32.xlu0 %v722_v43 }
 0x1ce   : > { %v689_v22 = vpop.xlane.xlu1 %688 }
 0x1cf   : > { %v706_v18 = vmul.f32 0.0078125, %v689_v22  ;;  %v723_v47 = vmul.f32 %v2593_v45, %v2593_v45  ;;  %v1010_v22 = vld [vmem:[%s3056_s2 + $0x130] sm:$0xff] }
 0x1d1   : > { %v2598_v48 = vsub.f32 %v2549_v44, %v706_v18  ;;  %734 = vadd.xlane.f32.xlu1 %v723_v47  ;;  %v1004_v44 = vld [vmem:[%s3056_s2 + $0x100] sm:$0xff]  ;;  %v1011_v18 = vld [vmem:[%s3056_s2 + $0x138] sm:$0xff] }
 0x1d2   : > { %v691_v29 = vpop.xlane.xlu0 %690  ;;  %v1931_v62 = vpack.c.bf16 %v1005_v57, %v1004_v44  ;;  %v996_v47 = vld [vmem:[%s3056_s2 + $0xc0] sm:$0xff] }
 0x1d3   : > { %v707_v49 = vmul.f32 0.0078125, %v691_v29  ;;  %v724_v50 = vmul.f32 %v2598_v48, %v2598_v48  ;;  %v997_v29 = vld [vmem:[%s3056_s2 + $0xc8] sm:$0xff] }
 0x1d4   : > { %1932 = vmatprep.subr.bf16.mxu1 %v1931_v62 }
 0x1d5   : > { %v2603_v53 = vsub.f32 %v2553_v52, %v707_v49  ;;  %736 = vadd.xlane.f32.xlu0 %v724_v50  ;;  %v990_v52 = vld [vmem:[%s3056_s2 + $0x90] sm:$0xff]  ;;  %1934 = vmatpush3.bf16.msra.mxu1 %v1931_v62  ;;  %v1943_v49 = vpack.c.bf16 %v1011_v18, %v1010_v22 }
 0x1d6   : > { %v693_v36 = vpop.xlane.xlu1 %692  ;;  %v1903_v0 = vpack.c.bf16 %v991_v59, %v990_v52  ;;  %1936 = vmatprep.subr.bf16.mxu1 %v1935_v17  ;;  %v1013_v52 = vld [vmem:[%s3056_s2 + $0x148] sm:$0xff]  ;;  %v998_v62 = vld [vmem:[%s3056_s2 + $0xd0] sm:$0xff] }
 0x1d7   : > { %v708_v54 = vmul.f32 0.0078125, %v693_v36  ;;  %v725_v55 = vmul.f32 %v2603_v53, %v2603_v53  ;;  %v1915_v36 = vpack.c.bf16 %v997_v29, %v996_v47 }
 0x1d8   : > { %1904 = vmatprep.subr.bf16.mxu0 %v1903_v0 }
 0x1d9   : > { %v2613_v58 = vsub.f32 %v664_v60, %v708_v54  ;;  %738 = vadd.xlane.f32.xlu1 %v725_v55  ;;  %v975_v60 = vld [vmem:[%s3056_s2 + $0x18] sm:$0xff]  ;;  %1938 = vmatpush3.bf16.msra.mxu1 %v1935_v17  ;;  %v980_v54 = vld [vmem:[%s3056_s2 + $0x40] sm:$0xff]  ;;  %v981_v55 = vld [vmem:[%s3056_s2 + $0x48] sm:$0xff]  ;;  %v1923_v17 = vpack.c.bf16 %v1001_v16, %v1000_v15 }
 0x1da   : > { %v695_v63 = vpop.xlane.xlu0 %694  ;;  %v1905_v8 = vpack.c.bf16 %v975_v60, %v974_v1  ;;  %1940 = vmatprep.subr.bf16.mxu1 %v1939_v33  ;;  %v1917_v44 = vpack.c.bf16 %v981_v55, %v980_v54  ;;  %v982_v60 = vld [vmem:[%s3056_s2 + $0x50] sm:$0xff]  ;;  %v800_v55 = vsub.s32 2, %v2525_v9 }
 0x1db   : > { %v709_v3 = vmul.f32 0.0078125, %v695_v63  ;;  %v726_v4 = vmul.f32 %v2613_v58, %v2613_v58  ;;  %v999_v63 = vld [vmem:[%s3056_s2 + $0xd8] sm:$0xff] }
 0x1dc   : > { %1906 = vmatpush3.bf16.msra.mxu0 %v1905_v8  ;;  %v1919_v1 = vpack.c.bf16 %v999_v63, %v998_v62  ;;  %v1014_v8 = vld [vmem:[%s3056_s2 + $0x150] sm:$0xff]  ;;  %v841_v62 = vadd.s32 8, %v2525_v9 }
 0x1dd   : > { %v2636_v14 = vsub.f32 %v2558_v6, %v709_v3  ;;  %740 = vadd.xlane.f32.xlu0 %v726_v4  ;;  %v977_v6 = vld [vmem:[%s3056_s2 + $0x28] sm:$0xff]  ;;  %1908 = vmatprep.subr.bf16.mxu0 %v1907_v21  ;;  %v983_v3 = vld [vmem:[%s3056_s2 + $0x58] sm:$0xff]  ;;  %v1951_v12 = vpack.c.bf16 %v1015_v10, %v1014_v8  ;;  %v843_v10 = vadd.s32 24, %v2525_v9 }
 0x1de   : > { %v697_v20 = vpop.xlane.xlu1 %696  ;;  %v1909_v27 = vpack.c.bf16 %v977_v6, %v976_v23  ;;  %1942 = vmatpush3.bf16.msra.mxu1 %v1939_v33  ;;  %v1921_v4 = vpack.c.bf16 %v983_v3, %v982_v60  ;;  %v985_v21 = vld [vmem:[%s3056_s2 + $0x68] sm:$0xff]  ;;  %v1016_v6 = vld [vmem:[%s3056_s2 + $0x160] sm:$0xff]  ;;  %v1929_v33 = vpack.c.bf16 %v987_v32, %v986_v31  ;;  %v2773_v60 = vrot.slane %v2531_v11, %v800_v55 }
 0x1df   : > { %v710_v25 = vmul.f32 0.0078125, %v697_v20  ;;  %v727_v26 = vmul.f32 %v2636_v14, %v2636_v14  ;;  %1944 = vmatprep.subr.bf16.mxu1 %v1943_v49  ;;  %v984_v20 = vld [vmem:[%s3056_s2 + $0x60] sm:$0xff]  ;;  %v842_v3 = vadd.s32 16, %v2525_v9 }
 0x1e0   : > { %1910 = vmatpush3.bf16.msra.mxu0 %v1909_v27  ;;  %v1925_v23 = vpack.c.bf16 %v985_v21, %v984_v20  ;;  %v1002_v27 = vld [vmem:[%s3056_s2 + $0xf0] sm:$0xff] }
 0x1e1   : > { %v2659_v30 = vsub.f32 %v2562_v19, %v710_v25  ;;  %742 = vadd.xlane.f32.xlu1 %v727_v26  ;;  %v979_v19 = vld [vmem:[%s3056_s2 + $0x38] sm:$0xff]  ;;  %1912 = vmatprep.subr.bf16.mxu0 %v1911_v35  ;;  %v1017_v25 = vld [vmem:[%s3056_s2 + $0x168] sm:$0xff]  ;;  %v1927_v28 = vpack.c.bf16 %v1003_v13, %v1002_v27  ;;  %v1018_v35 = vld [vmem:[%s3056_s2 + $0x170] sm:$0xff] }
 0x1e2   : > { %v1913_v41 = vpack.c.bf16 %v979_v19, %v978_v37  ;;  %1946 = vmatpush3.bf16.msra.mxu1 %v1943_v49  ;;  %v1955_v26 = vpack.c.bf16 %v1017_v25, %v1016_v6  ;;  %v1019_v37 = vld [vmem:[%s3056_s2 + $0x178] sm:$0xff]  ;;  %v787_v49 = vsub.s32 1, %v2525_v9 }
 0x1e3   : > { %v701_v38 = vpop.xlane.xlu0 %700  ;;  %v728_v40 = vmul.f32 %v2659_v30, %v2659_v30  ;;  %v1959_v19 = vpack.c.bf16 %v1019_v37, %v1018_v35 }
 0x1e4   : > { %v711_v43 = vmul.f32 0.0078125, %v701_v38  ;;  %1914 = vmatpush3.bf16.msra.mxu0 %v1913_v41 }
 0x1e5   : > { %744 = vadd.xlane.f32.xlu0 %v728_v40  ;;  %1916 = vmatprep.subr.bf16.mxu0 %v1915_v36 }
 0x1e6   : > { %v2688_v50 = vsub.f32 %v2566_v24, %v711_v43  ;;  %v1012_v24 = vld [vmem:[%s3056_s2 + $0x140] sm:$0xff] }
 0x1e7   : > { %v1947_v59 = vpack.c.bf16 %v1013_v52, %v1012_v24  ;;  %v2766_v24 = vrot.slane %v2531_v11, %v787_v49 }
 0x1e8   : > { %v729_v57 = vmul.f32 %v2688_v50, %v2688_v50  ;;  %1918 = vmatpush3.bf16.msra.mxu0 %v1917_v44  ;;  %v2763_v44 = vstv %s1556_s14 }
 0x1e9   : > { %1948 = vmatprep.subr.bf16.mxu1 %v1947_v59  ;;  %1920 = vmatprep.subr.bf16.mxu0 %v1919_v1  ;;  %v850_v63 = vadd.s32 %v2763_v44, %v2525_v9  ;;  %v851_v16 = vadd.s32 %v2763_v44, %v841_v62  ;;  %v852_v21 = vadd.s32 %v2763_v44, %v842_v3 }
 0x1ea   : > { %v746_v0 = vsel %vm698_vm3, %v729_v57, 0.0  ;;  %1950 = vmatpush3.bf16.msra.mxu1 %v1947_v59  ;;  %v853_v27 = vadd.s32 %v2763_v44, %v843_v10 }
 0x1eb   : > { %747 = vadd.xlane.f32.xlu1 %v746_v0  ;;  %1952 = vmatprep.subr.bf16.mxu1 %v1951_v12  ;;  %vm859_vm4 = vcmp.ge.s32.totalorder %v850_v63, 0  ;;  %vm868_vm5 = vcmp.lt.s32.totalorder %v850_v63, 200  ;;  %vm860_vm8 = vcmp.ge.s32.totalorder %v851_v16, 0  ;;  %vm869_vm9 = vcmp.lt.s32.totalorder %v851_v16, 200 }
 0x1ec   : > { %1922 = vmatpush3.bf16.msra.mxu0 %v1921_v4  ;;  %vm2783_vm7 = vmand %vm859_vm4, %vm868_vm5  ;;  %vm861_vm10 = vcmp.ge.s32.totalorder %v852_v21, 0  ;;  %vm870_vm11 = vcmp.lt.s32.totalorder %v852_v21, 200  ;;  %vm862_vm14 = vcmp.ge.s32.totalorder %v853_v27, 0  ;;  %vm871_vm15 = vcmp.lt.s32.totalorder %v853_v27, 200 }
 0x1ed   : > { %1924 = vmatprep.subr.bf16.mxu0 %v1923_v17  ;;  %vm2795_vm13 = vmand %vm860_vm8, %vm869_vm9 }
 0x1ee   : > { %1954 = vmatpush3.bf16.msra.mxu1 %v1951_v12  ;;  %vm2808_vm3 = vmand %vm861_vm10, %vm870_vm11 }
 0x1ef   : > { %1956 = vmatprep.subr.bf16.mxu1 %v1955_v26  ;;  %vm2825_vm8 = vmand %vm862_vm14, %vm871_vm15 }
 0x1f0   : > { %1926 = vmatpush3.bf16.msra.mxu0 %v1925_v23 }
 0x1f1   : > { %1928 = vmatprep.subr.bf16.mxu0 %v1927_v28 }
 0x1f2   : > { %1958 = vmatpush3.bf16.msra.mxu1 %v1955_v26 }
 0x1f3   : > { %1960 = vmatprep.subr.bf16.mxu1 %v1959_v19 }
 0x1f4   : > { %1930 = vmatpush3.bf16.msra.mxu0 %v1929_v33 }
 0x1f6   : > { %1962 = vmatpush3.bf16.msra.mxu1 %v1959_v19 }
 0x256   : > { %v731_v38 = vpop.xlane.xlu1 %730 }
 0x257   : > { %v749_v40 = vmul.f32 0.0078125, %v731_v38 }
 0x259   : > { %v758_v41 = vadd.f32 1e-05, %v749_v40 }
 0x25a   : > { %v733_v43 = vpop.xlane.xlu0 %732 }
 0x25b   : > { %2039 = vrsqrt.f32 %v758_v41  ;;  %v750_v22 = vmul.f32 0.0078125, %v733_v43 }
 0x25d   : > { %v759_v18 = vadd.f32 1e-05, %v750_v22 }
 0x25e   : > { %v735_v47 = vpop.xlane.xlu1 %734 }
 0x25f   : > { %2041 = vrsqrt.f32 %v759_v18  ;;  %v751_v29 = vmul.f32 0.0078125, %v735_v47  ;;  %v845_v18 = vadd.s32 40, %v2525_v9 }
 0x261   : > { %v760_v36 = vadd.f32 1e-05, %v751_v29 }
 0x262   : > { %v737_v54 = vpop.xlane.xlu0 %736 }
 0x263   : > { %2043 = vrsqrt.f32 %v760_v36  ;;  %v752_v57 = vmul.f32 0.0078125, %v737_v54 }
 0x265   : > { %v2040_v52 = vpop.eup %2039  ;;  %v761_v59 = vadd.f32 1e-05, %v752_v57 }
 0x266   : > { %v776_v0 = vmul.f32 %v2040_v52, %v2583_v34  ;;  %v739_v1 = vpop.xlane.xlu1 %738 }
 0x267   : > { %2045 = vrsqrt.f32 %v761_v59  ;;  %v753_v4 = vmul.f32 0.0078125, %v739_v1 }
 0x268   : > { %v789_v8 = vmul.f32 %v2766_v24, %v776_v0 }
 0x269   : > { %v2042_v12 = vpop.eup %2041  ;;  %v762_v15 = vadd.f32 1e-05, %v753_v4  ;;  %v855_v4 = vadd.s32 %v2763_v44, %v845_v18  ;;  %v847_v18 = vadd.s32 56, %v2525_v9 }
 0x26a   : > { %v777_v34 = vmul.f32 %v2042_v12, %v2588_v39  ;;  %v741_v17 = vpop.xlane.xlu0 %740  ;;  %v802_v20 = vadd.f32 %v2773_v60, %v789_v8  ;;  %v844_v39 = vadd.s32 32, %v2525_v9  ;;  %v846_v8 = vadd.s32 48, %v2525_v9 }
 0x26b   : > { %2047 = vrsqrt.f32 %v762_v15  ;;  %v754_v23 = vmul.f32 0.0078125, %v741_v17  ;;  %vm864_vm9 = vcmp.ge.s32.totalorder %v855_v4, 0  ;;  %vm873_vm11 = vcmp.lt.s32.totalorder %v855_v4, 200 }
 0x26c   : > { %v790_v6 = vmul.f32 %v2766_v24, %v777_v34  ;;  %vm811_vm6 = vcmp.gt.f32.partialorder %v802_v20, 0.0  ;;  %v820_v25 = vmul.f32 0.2, %v802_v20  ;;  %v854_v22 = vadd.s32 %v2763_v44, %v844_v39  ;;  %vm2854_vm14 = vmand %vm864_vm9, %vm873_vm11 }
 0x26d   : > { %v2044_v13 = vpop.eup %2043  ;;  %v763_v28 = vadd.f32 1e-05, %v754_v23 }
 0x26e   : > { %v778_v31 = vmul.f32 %v2044_v13, %v2593_v45  ;;  %v743_v32 = vpop.xlane.xlu1 %742  ;;  %v803_v33 = vadd.f32 %v2773_v60, %v790_v6  ;;  %v829_v35 = vsel %vm811_vm6, %v802_v20, %v820_v25  ;;  %vm863_vm4 = vcmp.ge.s32.totalorder %v854_v22, 0 }
 0x26f   : > { %2049 = vrsqrt.f32 %v763_v28  ;;  %v755_v37 = vmul.f32 0.0078125, %v743_v32  ;;  %v904_v19 = vsel %vm2783_vm7, %v829_v35, 0.0  ;;  %vm872_vm5 = vcmp.lt.s32.totalorder %v854_v22, 200 }
 0x270   : > { %v791_v38 = vmul.f32 %v2766_v24, %v778_v31  ;;  %vm812_vm12 = vcmp.gt.f32.partialorder %v803_v33, 0.0  ;;  %v821_v40 = vmul.f32 0.2, %v803_v33  ;;  %v922_v36 = vrot.slane %v904_v19, 1  ;;  %vm2841_vm10 = vmand %vm863_vm4, %vm872_vm5 }
 0x271   : > { %v2046_v45 = vpop.eup %2045  ;;  %v764_v43 = vadd.f32 1e-05, %v755_v37  ;;  %v947_v52 = vrot.slane %v904_v19, 2  ;;  %v856_v32 = vadd.s32 %v2763_v44, %v846_v8 }
 0x272   : > { %v779_v47 = vmul.f32 %v2046_v45, %v2598_v48  ;;  %v745_v29 = vpop.xlane.xlu0 %744  ;;  %v830_v49 = vsel %vm812_vm12, %v803_v33, %v821_v40  ;;  %v804_v54 = vadd.f32 %v2773_v60, %v791_v38 }
 0x273   : > { %2051 = vrsqrt.f32 %v764_v43  ;;  %v756_v55 = vmul.f32 0.0078125, %v745_v29  ;;  %v905_v57 = vsel %vm2795_vm13, %v830_v49, 0.0  ;;  %vm865_vm12 = vcmp.ge.s32.totalorder %v856_v32, 0 }
 0x274   : > { %v792_v59 = vmul.f32 %v2766_v24, %v779_v47  ;;  %v923_v62 = vrot.slane %v905_v57, 1  ;;  %v948_v63 = vrot.slane %v905_v57, 2  ;;  %vm813_vm0 = vcmp.gt.f32.partialorder %v804_v54, 0.0 }
 0x275   : > { %v2048_v0 = vpop.eup %2047  ;;  %v765_v1 = vadd.f32 1e-05, %v756_v55  ;;  %v822_v3 = vmul.f32 0.2, %v804_v54  ;;  %vm874_vm15 = vcmp.lt.s32.totalorder %v856_v32, 200 }
 0x276   : > { %v780_v10 = vmul.f32 %v2048_v0, %v2603_v53  ;;  %v924_v12 = vsel %vm356_vm1, %v922_v36, %v923_v62  ;;  %v949_v15 = vsel %vm383_vm2, %v947_v52, %v948_v63  ;;  %v805_v16 = vadd.f32 %v2773_v60, %v792_v59 }
 0x277   : > { %2053 = vrsqrt.f32 %v765_v1  ;;  %1088 = vmatprep.mubr.f32.mxu0 %v924_v12  ;;  %1831 = vmatprep.mubr.f32.mxu1 %v949_v15  ;;  %v831_v34 = vsel %vm813_vm0, %v804_v54, %v822_v3  ;;  %v848_v3 = vadd.s32 64, %v2525_v9 }
 0x278   : > { %v793_v17 = vmul.f32 %v2766_v24, %v780_v10  ;;  %v748_v20 = vpop.xlane.xlu1 %747  ;;  %1557 = vmatmul.mubr.msk.f32.vlgmr.msra.gmra.mrb[18].mxu0 %vm2783_vm7, %v829_v35  ;;  %v906_v53 = vsel %vm2808_vm3, %v831_v34, 0.0  ;;  %vm814_vm6 = vcmp.gt.f32.partialorder %v805_v16, 0.0  ;;  %v823_v21 = vmul.f32 0.2, %v805_v16 }
 0x279   : > { %v2050_v6 = vpop.eup %2049  ;;  %v757_v25 = vmul.f32 0.0078125, %v748_v20  ;;  %v925_v13 = vrot.slane %v906_v53, 1  ;;  %v950_v28 = vrot.slane %v906_v53, 2  ;;  %v858_v53 = vadd.s32 %v2763_v44, %v848_v3 }
 0x27a   : > { %v781_v39 = vmul.f32 %v2050_v6, %v2613_v58  ;;  %v832_v26 = vsel %vm814_vm6, %v805_v16, %v823_v21  ;;  %v806_v31 = vadd.f32 %v2773_v60, %v793_v17 }
 0x27b   : > { %v766_v33 = vadd.f32 1e-05, %v757_v25  ;;  %v926_v35 = vsel %vm356_vm1, %v923_v62, %v925_v13  ;;  %v951_v27 = vsel %vm383_vm2, %v948_v63, %v950_v28  ;;  %v907_v37 = vsel %vm2825_vm8, %v832_v26, 0.0 }
 0x27c   : > { %v794_v19 = vmul.f32 %v2766_v24, %v781_v39  ;;  %1093 = vmatprep.mubr.f32.mxu0 %v926_v35  ;;  %1832 = vmatmul.mubr.f32.vlgmr.msra.gmra.mrb[18].mxu1 %v951_v27  ;;  %v927_v38 = vrot.slane %v907_v37, 1  ;;  %v952_v40 = vrot.slane %v907_v37, 2  ;;  %vm815_vm7 = vcmp.gt.f32.partialorder %v806_v31, 0.0 }
 0x27d   : > { %v2052_v58 = vpop.eup %2051  ;;  %2055 = vrsqrt.f32 %v766_v33  ;;  %1558 = vmatmul.mubr.msk.f32.gmra.mrb[20].mxu0 %vm2795_vm13, %v830_v49  ;;  %v824_v45 = vmul.f32 0.2, %v806_v31  ;;  %v857_v62 = vadd.s32 %v2763_v44, %v847_v18  ;;  %vm867_vm9 = vcmp.ge.s32.totalorder %v858_v53, 0 }
 0x27e   : > { %v782_v47 = vmul.f32 %v2052_v58, %v2636_v14  ;;  %v928_v29 = vsel %vm356_vm1, %v925_v13, %v927_v38  ;;  %v953_v36 = vsel %vm383_vm2, %v950_v28, %v952_v40  ;;  %v807_v54 = vadd.f32 %v2773_v60, %v794_v19 }
 0x27f   : > { %1098 = vmatprep.mubr.f32.mxu0 %v928_v29  ;;  %1834 = vmatprep.mubr.f32.mxu1 %v953_v36  ;;  %v833_v41 = vsel %vm815_vm7, %v806_v31, %v824_v45  ;;  %vm866_vm4 = vcmp.ge.s32.totalorder %v857_v62, 0  ;;  %vm875_vm5 = vcmp.lt.s32.totalorder %v857_v62, 200  ;;  %vm876_vm7 = vcmp.lt.s32.totalorder %v858_v53, 200 }
 0x280   : > { %v795_v22 = vmul.f32 %v2766_v24, %v782_v47  ;;  %v908_v49 = vsel %vm2841_vm10, %v833_v41, 0.0  ;;  %vm816_vm13 = vcmp.gt.f32.partialorder %v807_v54, 0.0  ;;  %v825_v55 = vmul.f32 0.2, %v807_v54  ;;  %vm885_vm11 = vmand %vm867_vm9, %vm876_vm7 }
 0x281   : > { %v2054_v57 = vpop.eup %2053  ;;  %1559 = vmatmul.mubr.msk.f32.gmra.mrb[22].mxu0 %vm2808_vm3, %v831_v34  ;;  %v929_v52 = vrot.slane %v908_v49, 1  ;;  %v954_v59 = vrot.slane %v908_v49, 2  ;;  %vm2873_vm3 = vmand %vm865_vm12, %vm874_vm15  ;;  %v1022_v47 = vsub.s32 3, %v2525_v9 }
 0x282   : > { %v783_v63 = vmul.f32 %v2054_v57, %v2659_v30  ;;  %v834_v0 = vsel %vm816_vm13, %v807_v54, %v825_v55  ;;  %v808_v1 = vadd.f32 %v2773_v60, %v795_v22 }
 0x283   : > { %v930_v4 = vsel %vm356_vm1, %v927_v38, %v929_v52  ;;  %v955_v8 = vsel %vm383_vm2, %v952_v40, %v954_v59  ;;  %v909_v48 = vsel %vm2854_vm14, %v834_v0, 0.0  ;;  %v1023_v36 = vrot.slane %v2531_v11, %v1022_v47 }
 0x284   : > { %v796_v10 = vmul.f32 %v2766_v24, %v783_v63  ;;  %1103 = vmatprep.mubr.f32.mxu0 %v930_v4  ;;  %1835 = vmatmul.mubr.f32.gmra.mrb[20].mxu1 %v955_v8  ;;  %v931_v12 = vrot.slane %v909_v48, 1  ;;  %v956_v15 = vrot.slane %v909_v48, 2  ;;  %vm817_vm0 = vcmp.gt.f32.partialorder %v808_v1, 0.0 }
 0x285   : > { %1560 = vmatmul.mubr.msk.f32.gmra.mrb[24].mxu0 %vm2825_vm8, %v832_v26  ;;  %v826_v30 = vmul.f32 0.2, %v808_v1  ;;  %vm2884_vm8 = vmand %vm866_vm4, %vm875_vm5 }
 0x286   : > { %v932_v34 = vsel %vm356_vm1, %v929_v52, %v931_v12  ;;  %v957_v17 = vsel %vm383_vm2, %v954_v59, %v956_v15  ;;  %v809_v20 = vadd.f32 %v2773_v60, %v796_v10 }
 0x287   : > { %v2056_v21 = vpop.eup %2055  ;;  %1108 = vmatprep.mubr.f32.mxu0 %v932_v34  ;;  %1837 = vmatprep.mubr.f32.mxu1 %v957_v17  ;;  %v835_v23 = vsel %vm817_vm0, %v808_v1, %v826_v30 }
 0x288   : > { %v784_v6 = vmul.f32 %v2056_v21, %v2688_v50  ;;  %v910_v25 = vsel %vm2873_vm3, %v835_v23, 0.0  ;;  %vm818_vm6 = vcmp.gt.f32.partialorder %v809_v20, 0.0  ;;  %v827_v13 = vmul.f32 0.2, %v809_v20 }
 0x289   : > { %1561 = vmatmul.mubr.msk.f32.gmra.mrb[26].mxu0 %vm2841_vm10, %v833_v41  ;;  %v933_v39 = vrot.slane %v910_v25, 1  ;;  %v958_v44 = vrot.slane %v910_v25, 2 }
 0x28a   : > { %v797_v26 = vmul.f32 %v2766_v24, %v784_v6  ;;  %v836_v31 = vsel %vm818_vm6, %v809_v20, %v827_v13 }
 0x28b   : > { %v934_v50 = vsel %vm356_vm1, %v931_v12, %v933_v39  ;;  %v959_v32 = vsel %vm383_vm2, %v956_v15, %v958_v44  ;;  %v911_v33 = vsel %vm2884_vm8, %v836_v31, 0.0 }
 0x28c   : > { %1113 = vmatprep.mubr.f32.mxu0 %v934_v50  ;;  %1838 = vmatmul.mubr.f32.gmra.mrb[22].mxu1 %v959_v32  ;;  %v935_v35 = vrot.slane %v911_v33, 1  ;;  %v960_v27 = vrot.slane %v911_v33, 2  ;;  %v810_v37 = vadd.f32 %v2773_v60, %v797_v26 }
 0x28d   : > { %1562 = vmatmul.mubr.msk.f32.gmra.mrb[28].mxu0 %vm2854_vm14, %v834_v0 }
 0x28e   : > { %v936_v24 = vsel %vm356_vm1, %v933_v39, %v935_v35  ;;  %v961_v19 = vsel %vm383_vm2, %v958_v44, %v960_v27  ;;  %vm819_vm10 = vcmp.gt.f32.partialorder %v810_v37, 0.0  ;;  %v828_v38 = vmul.f32 0.2, %v810_v37 }
 0x28f   : > { %1118 = vmatprep.mubr.f32.mxu0 %v936_v24  ;;  %1840 = vmatprep.mubr.f32.mxu1 %v961_v19 }
 0x290   : > { %v837_v40 = vsel %vm819_vm10, %v810_v37, %v828_v38 }
 0x291   : > { %1563 = vmatmul.mubr.msk.f32.gmra.mrb[30].mxu0 %vm2873_vm3, %v835_v23  ;;  %v912_v58 = vsel %vm885_vm11, %v837_v40, 0.0 }
 0x292   : > { %v937_v45 = vrot.slane %v912_v58, 1  ;;  %v962_v60 = vrot.slane %v912_v58, 2 }
 0x294   : > { %v938_v43 = vsel %vm356_vm1, %v935_v35, %v937_v45  ;;  %v963_v18 = vsel %vm383_vm2, %v960_v27, %v962_v60 }
 0x295   : > { %1123 = vmatprep.mubr.f32.mxu0 %v938_v43  ;;  %1841 = vmatmul.mubr.f32.gmra.mrb[24].mxu1 %v963_v18 }
 0x296   : > { %1564 = vmatmul.mubr.msk.f32.gmra.mrb[32].mxu0 %vm2884_vm8, %v836_v31 }
 0x34b   : > { %v1692_v29 = vpop.f32.mrb[18].mxu0 }
 0x34c   : > { %v1693_v54 = vpop.f32.mrb[19].mxu0 }
 0x34d   : > { %v1694_v41 = vadd.f32 %v1693_v54, %v1692_v29 }
 0x34f   : > { %v1833_v22 = vpop.f32.mrb[18].mxu1  ;;  %v1091_v49 = vadd.f32 %v1694_v41, %v1023_v36 }
 0x350   : > { %v1695_v55 = vpop.f32.mrb[20].mxu0  ;;  %v1195_v14 = vpop.f32.mrb[19].mxu1 }
 0x351   : > { %v1196_v57 = vadd.f32 %v1195_v14, %v1091_v49  ;;  %v1696_v52 = vpop.f32.mrb[21].mxu0 }
 0x352   : > { %v1697_v59 = vadd.f32 %v1696_v52, %v1695_v55 }
 0x353   : > { %1234 = vadd.xlane.f32.xlu0 %v1196_v57 }
 0x354   : > { %v1096_v62 = vadd.f32 %v1697_v59, %v1023_v36  ;;  %v1698_v63 = vpop.f32.mrb[22].mxu0 }
 0x355   : > { %v1699_v0 = vpop.f32.mrb[23].mxu0 }
 0x356   : > { %v1700_v1 = vadd.f32 %v1699_v0, %v1698_v63  ;;  %v1201_v3 = vadd.f32 %v1833_v22, %v1096_v62 }
 0x357   : > { %v1836_v4 = vpop.f32.mrb[20].mxu1 }
 0x358   : > { %1236 = vadd.xlane.f32.xlu1 %v1201_v3  ;;  %v1701_v8 = vpop.f32.mrb[24].mxu0  ;;  %v1101_v48 = vadd.f32 %v1700_v1, %v1023_v36  ;;  %v1205_v11 = vpop.f32.mrb[21].mxu1 }
 0x359   : > { %v1702_v10 = vpop.f32.mrb[25].mxu0 }
 0x35a   : > { %v1206_v12 = vadd.f32 %v1205_v11, %v1101_v48  ;;  %v1703_v15 = vadd.f32 %v1702_v10, %v1701_v8 }
 0x35c   : > { %v1106_v30 = vadd.f32 %v1703_v15, %v1023_v36  ;;  %1238 = vadd.xlane.f32.xlu0 %v1206_v12  ;;  %v1704_v16 = vpop.f32.mrb[26].mxu0 }
 0x35d   : > { %v1705_v34 = vpop.f32.mrb[27].mxu0 }
 0x35e   : > { %v1706_v17 = vadd.f32 %v1705_v34, %v1704_v16  ;;  %v1211_v20 = vadd.f32 %v1836_v4, %v1106_v30 }
 0x35f   : > { %v1839_v53 = vpop.f32.mrb[22].mxu1 }
 0x360   : > { %1240 = vadd.xlane.f32.xlu1 %v1211_v20  ;;  %v1707_v21 = vpop.f32.mrb[28].mxu0  ;;  %v1111_v23 = vadd.f32 %v1706_v17, %v1023_v36  ;;  %v1215_v6 = vpop.f32.mrb[23].mxu1 }
 0x361   : > { %v1708_v25 = vpop.f32.mrb[29].mxu0 }
 0x362   : > { %v1216_v13 = vadd.f32 %v1215_v6, %v1111_v23  ;;  %v1709_v28 = vadd.f32 %v1708_v25, %v1707_v21 }
 0x364   : > { %v1116_v39 = vadd.f32 %v1709_v28, %v1023_v36  ;;  %1242 = vadd.xlane.f32.xlu0 %v1216_v13  ;;  %v1710_v44 = vpop.f32.mrb[30].mxu0 }
 0x365   : > { %v1711_v26 = vpop.f32.mrb[31].mxu0 }
 0x366   : > { %v1712_v31 = vadd.f32 %v1711_v26, %v1710_v44  ;;  %v1221_v50 = vadd.f32 %v1839_v53, %v1116_v39  ;;  %v1336_v39 = vsub.s32 5, %v2525_v9 }
 0x368   : > { %1244 = vadd.xlane.f32.xlu1 %v1221_v50  ;;  %v1842_v32 = vpop.f32.mrb[24].mxu1  ;;  %v1121_v33 = vadd.f32 %v1712_v31, %v1023_v36  ;;  %v2073_v31 = vld [vmem:[%s3057_s3] sm:$0x3f] }
 0x369   : > { %v1713_v35 = vpop.f32.mrb[32].mxu0  ;;  %v1225_v27 = vpop.f32.mrb[25].mxu1 }
 0x36a   : > { %v1226_v37 = vadd.f32 %v1225_v27, %v1121_v33  ;;  %v1714_v24 = vpop.f32.mrb[33].mxu0 }
 0x36b   : > { %v1715_v19 = vadd.f32 %v1714_v24, %v1713_v35  ;;  %v2940_v35 = vrot.slane %v2073_v31, %v1336_v39 }
 0x36c   : > { %1246 = vadd.xlane.f32.xlu0 %v1226_v37 }
 0x36d   : > { %v1126_v38 = vadd.f32 %v1715_v19, %v1023_v36 }
 0x36f   : > { %v1231_v40 = vadd.f32 %v1842_v32, %v1126_v38 }
 0x371   : > { %1248 = vadd.xlane.f32.xlu1 %v1231_v40 }
 0x3e0   : > { %v1235_v58 = vpop.xlane.xlu0 %1234 }
 0x3e1   : > { %v1250_v45 = vmul.f32 0.0078125, %v1235_v58 }
 0x3e3   : > { %v1258_v60 = vsub.f32 %v1196_v57, %v1250_v45 }
 0x3e5   : > { %v1237_v43 = vpop.xlane.xlu1 %1236  ;;  %v1266_v18 = vmul.f32 %v1258_v60, %v1258_v60 }
 0x3e6   : > { %v1251_v47 = vmul.f32 0.0078125, %v1237_v43 }
 0x3e7   : > { %1274 = vadd.xlane.f32.xlu0 %v1266_v18 }
 0x3e8   : > { %v1259_v29 = vsub.f32 %v1201_v3, %v1251_v47 }
 0x3e9   : > { %v1239_v54 = vpop.xlane.xlu0 %1238 }
 0x3ea   : > { %v1252_v41 = vmul.f32 0.0078125, %v1239_v54  ;;  %v1267_v22 = vmul.f32 %v1259_v29, %v1259_v29 }
 0x3ec   : > { %v2909_v49 = vsub.f32 %v1206_v12, %v1252_v41  ;;  %1276 = vadd.xlane.f32.xlu1 %v1267_v22 }
 0x3ed   : > { %v1241_v55 = vpop.xlane.xlu1 %1240 }
 0x3ee   : > { %v1253_v14 = vmul.f32 0.0078125, %v1241_v55  ;;  %v1268_v36 = vmul.f32 %v2909_v49, %v2909_v49 }
 0x3f0   : > { %v2913_v52 = vsub.f32 %v1211_v20, %v1253_v14  ;;  %1278 = vadd.xlane.f32.xlu0 %v1268_v36 }
 0x3f1   : > { %v1243_v57 = vpop.xlane.xlu0 %1242 }
 0x3f2   : > { %v1254_v59 = vmul.f32 0.0078125, %v1243_v57  ;;  %v1269_v62 = vmul.f32 %v2913_v52, %v2913_v52 }
 0x3f4   : > { %v2917_v63 = vsub.f32 %v1216_v13, %v1254_v59  ;;  %1280 = vadd.xlane.f32.xlu1 %v1269_v62  ;;  %v1324_v13 = vsub.s32 4, %v2525_v9 }
 0x3f5   : > { %v1245_v0 = vpop.xlane.xlu1 %1244 }
 0x3f6   : > { %v1255_v1 = vmul.f32 0.0078125, %v1245_v0  ;;  %v1270_v3 = vmul.f32 %v2917_v63, %v2917_v63 }
 0x3f8   : > { %v2921_v4 = vsub.f32 %v1221_v50, %v1255_v1  ;;  %1282 = vadd.xlane.f32.xlu0 %v1270_v3  ;;  %v2938_v50 = vrot.slane %v2073_v31, %v1324_v13 }
 0x3f9   : > { %v1247_v8 = vpop.xlane.xlu0 %1246 }
 0x3fa   : > { %v1256_v48 = vmul.f32 0.0078125, %v1247_v8  ;;  %v1271_v11 = vmul.f32 %v2921_v4, %v2921_v4 }
 0x3fc   : > { %v2925_v10 = vsub.f32 %v1226_v37, %v1256_v48  ;;  %1284 = vadd.xlane.f32.xlu1 %v1271_v11 }
 0x3fe   : > { %v1249_v12 = vpop.xlane.xlu1 %1248  ;;  %v1272_v15 = vmul.f32 %v2925_v10, %v2925_v10 }
 0x3ff   : > { %v1257_v30 = vmul.f32 0.0078125, %v1249_v12 }
 0x400   : > { %1286 = vadd.xlane.f32.xlu0 %v1272_v15 }
 0x401   : > { %v2929_v16 = vsub.f32 %v1231_v40, %v1257_v30 }
 0x403   : > { %v1273_v34 = vmul.f32 %v2929_v16, %v2929_v16 }
 0x405   : > { %1288 = vadd.xlane.f32.xlu1 %v1273_v34 }
 0x474   : > { %v1275_v17 = vpop.xlane.xlu0 %1274 }
 0x475   : > { %v1290_v20 = vmul.f32 0.0078125, %v1275_v17 }
 0x477   : > { %v1298_v53 = vadd.f32 1e-05, %v1290_v20 }
 0x479   : > { %2057 = vrsqrt.f32 %v1298_v53  ;;  %v1277_v21 = vpop.xlane.xlu1 %1276 }
 0x47a   : > { %v1291_v23 = vmul.f32 0.0078125, %v1277_v21 }
 0x47c   : > { %v1299_v6 = vadd.f32 1e-05, %v1291_v23 }
 0x47d   : > { %v1279_v25 = vpop.xlane.xlu0 %1278 }
 0x47e   : > { %2059 = vrsqrt.f32 %v1299_v6  ;;  %v1292_v28 = vmul.f32 0.0078125, %v1279_v25 }
 0x480   : > { %v1300_v44 = vadd.f32 1e-05, %v1292_v28 }
 0x481   : > { %v1281_v26 = vpop.xlane.xlu1 %1280 }
 0x482   : > { %2061 = vrsqrt.f32 %v1300_v44  ;;  %v1293_v32 = vmul.f32 0.0078125, %v1281_v26 }
 0x483   : > { %v2058_v33 = vpop.eup %2057 }
 0x484   : > { %v1314_v27 = vmul.f32 %v2058_v33, %v1258_v60  ;;  %v1301_v37 = vadd.f32 1e-05, %v1293_v32 }
 0x485   : > { %v1283_v24 = vpop.xlane.xlu0 %1282 }
 0x486   : > { %v1326_v19 = vmul.f32 %v2938_v50, %v1314_v27  ;;  %2063 = vrsqrt.f32 %v1301_v37  ;;  %v1294_v9 = vmul.f32 0.0078125, %v1283_v24 }
 0x488   : > { %v2060_v38 = vpop.eup %2059  ;;  %v1338_v40 = vadd.f32 %v2940_v35, %v1326_v19  ;;  %v1302_v58 = vadd.f32 1e-05, %v1294_v9 }
 0x489   : > { %v1315_v45 = vmul.f32 %v2060_v38, %v1259_v29  ;;  %v1285_v43 = vpop.xlane.xlu1 %1284 }
 0x48a   : > { %v1346_v18 = vadd.f32 %v1338_v40, %v2466_v42  ;;  %2065 = vrsqrt.f32 %v1302_v58  ;;  %v1295_v47 = vmul.f32 0.0078125, %v1285_v43 }
 0x48b   : > { %v1327_v54 = vmul.f32 %v2938_v50, %v1315_v45 }
 0x48c   : > { %v2062_v60 = vpop.eup %2061  ;;  %vm1354_vm1 = vcmp.gt.f32.partialorder %v1346_v18, 0.0  ;;  %v1362_v41 = vmul.f32 0.2, %v1346_v18  ;;  %v1303_v22 = vadd.f32 1e-05, %v1295_v47 }
 0x48d   : > { %v1339_v55 = vadd.f32 %v2940_v35, %v1327_v54  ;;  %v1316_v14 = vmul.f32 %v2062_v60, %v2909_v49  ;;  %v1287_v36 = vpop.xlane.xlu0 %1286 }
 0x48e   : > { %v1370_v57 = vsel %vm1354_vm1, %v1346_v18, %v1362_v41  ;;  %2067 = vrsqrt.f32 %v1303_v22  ;;  %v1296_v29 = vmul.f32 0.0078125, %v1287_v36 }
 0x48f   : > { %1378 = vst [vmem:[%s2280_s11] sm:$0xff] %v1370_v57  ;;  %v1347_v42 = vadd.f32 %v1339_v55, %v2474_v46  ;;  %v1328_v59 = vmul.f32 %v2938_v50, %v1316_v14 }
 0x490   : > { %v2064_v62 = vpop.eup %2063  ;;  %v1304_v0 = vadd.f32 1e-05, %v1296_v29 }
 0x491   : > { %vm1355_vm2 = vcmp.gt.f32.partialorder %v1347_v42, 0.0  ;;  %v1363_v1 = vmul.f32 0.2, %v1347_v42  ;;  %v1340_v3 = vadd.f32 %v2940_v35, %v1328_v59  ;;  %v1317_v8 = vmul.f32 %v2064_v62, %v2913_v52 }
 0x492   : > { %2069 = vrsqrt.f32 %v1304_v0  ;;  %v1289_v49 = vpop.xlane.xlu1 %1288 }
 0x493   : > { %v1371_v48 = vsel %vm1355_vm2, %v1347_v42, %v1363_v1  ;;  %v1348_v11 = vadd.f32 %v1340_v3, %v2483_v51  ;;  %v1329_v12 = vmul.f32 %v2938_v50, %v1317_v8  ;;  %v1297_v15 = vmul.f32 0.0078125, %v1289_v49 }
 0x494   : > { %v2066_v46 = vpop.eup %2065  ;;  %1379 = vst [vmem:[%s2280_s11 + $0x8] sm:$0xff] %v1371_v48 }
 0x495   : > { %vm1356_vm12 = vcmp.gt.f32.partialorder %v1348_v11, 0.0  ;;  %v1364_v30 = vmul.f32 0.2, %v1348_v11  ;;  %v1341_v34 = vadd.f32 %v2940_v35, %v1329_v12  ;;  %v1318_v17 = vmul.f32 %v2066_v46, %v2917_v63 }
 0x496   : > { %v1305_v20 = vadd.f32 1e-05, %v1297_v15 }
 0x497   : > { %v1372_v52 = vsel %vm1356_vm12, %v1348_v11, %v1364_v30  ;;  %v1349_v53 = vadd.f32 %v1341_v34, %v2491_v56  ;;  %v1330_v21 = vmul.f32 %v2938_v50, %v1318_v17 }
 0x498   : > { %v2068_v23 = vpop.eup %2067  ;;  %1380 = vst [vmem:[%s2280_s11 + $0x10] sm:$0xff] %v1372_v52  ;;  %2071 = vrsqrt.f32 %v1305_v20 }
 0x499   : > { %vm1357_vm13 = vcmp.gt.f32.partialorder %v1349_v53, 0.0  ;;  %v1365_v51 = vmul.f32 0.2, %v1349_v53  ;;  %v1342_v6 = vadd.f32 %v2940_v35, %v1330_v21  ;;  %v1319_v25 = vmul.f32 %v2068_v23, %v2921_v4 }
 0x49b   : > { %v1373_v13 = vsel %vm1357_vm13, %v1349_v53, %v1365_v51  ;;  %v1350_v63 = vadd.f32 %v1342_v6, %v2499_v61  ;;  %v1331_v28 = vmul.f32 %v2938_v50, %v1319_v25 }
 0x49c   : > { %v2070_v39 = vpop.eup %2069  ;;  %1381 = vst [vmem:[%s2280_s11 + $0x18] sm:$0xff] %v1373_v13 }
 0x49d   : > { %vm1358_vm14 = vcmp.gt.f32.partialorder %v1350_v63, 0.0  ;;  %v1366_v56 = vmul.f32 0.2, %v1350_v63  ;;  %v1343_v44 = vadd.f32 %v2940_v35, %v1331_v28  ;;  %v1320_v26 = vmul.f32 %v2070_v39, %v2925_v10 }
 0x49f   : > { %v1374_v31 = vsel %vm1358_vm14, %v1350_v63, %v1366_v56  ;;  %v1351_v32 = vadd.f32 %v1343_v44, %v2507_v2  ;;  %v1332_v4 = vmul.f32 %v2938_v50, %v1320_v26 }
 0x4a0   : > { %1382 = vst [vmem:[%s2280_s11 + $0x20] sm:$0xff] %v1374_v31 }
 0x4a1   : > { %vm1359_vm15 = vcmp.gt.f32.partialorder %v1351_v32, 0.0  ;;  %v1367_v61 = vmul.f32 0.2, %v1351_v32  ;;  %v1344_v33 = vadd.f32 %v2940_v35, %v1332_v4 }
 0x4a2   : > { %v2072_v27 = vpop.eup %2071 }
 0x4a3   : > { %v1375_v37 = vsel %vm1359_vm15, %v1351_v32, %v1367_v61  ;;  %v1352_v24 = vadd.f32 %v1344_v33, %v2514_v5  ;;  %v1321_v19 = vmul.f32 %v2072_v27, %v2929_v16 }
 0x4a4   : > { %1383 = vst [vmem:[%s2280_s11 + $0x28] sm:$0xff] %v1375_v37 }
 0x4a5   : > { %vm1360_vm0 = vcmp.gt.f32.partialorder %v1352_v24, 0.0  ;;  %v1368_v10 = vmul.f32 0.2, %v1352_v24  ;;  %v1333_v2 = vmul.f32 %v2938_v50, %v1321_v19 }
 0x4a7   : > { %v1376_v9 = vsel %vm1360_vm0, %v1352_v24, %v1368_v10  ;;  %v1345_v38 = vadd.f32 %v2940_v35, %v1333_v2 }
 0x4a8   : > { %1384 = vst [vmem:[%s2280_s11 + $0x30] sm:$0xff] %v1376_v9  ;;  %1393 = sbr.rel (!%p2254_p3) target bundleno = 1228 (0x4cc), region = 118 }
 0x4a9   : > { %v1353_v40 = vadd.f32 %v1345_v38, %v2520_v7 }
 0x4ab   : > { %vm1361_vm3 = vcmp.gt.f32.partialorder %v1353_v40, 0.0  ;;  %v1369_v58 = vmul.f32 0.2, %v1353_v40 }
 0x4ad   : > { %v1377_v45 = vsel %vm1361_vm3, %v1353_v40, %v1369_v58 }
 0x4ae   : > { %1385 = vst [vmem:[%s2280_s11 + $0x38] sm:$0xff] %v1377_v45 }
 0x4af   : > { %s3094_s9 = smov (!%p1396_p0, %s1395_s9), 8 }
 0x4b0   : > { %s2987_s5 = sshll.u32 %s3094_s9, 7 }
 0x4b1   : > { %s1400_s8 = ssub.s32 1024, %s2987_s5 }
 0x4b2   : > { %1401 = vsyncadd %s2982_s27, %s1400_s8  ;;  %p1568_p1 = scmp.ne.s32.totalorder %s2987_s5, 0  ;;  %s1963_s13 = smul.u32 25, %s2158_s19 }
 0x4b3   : > { %s1408_s28 = sshll.u32 %s2280_s11, 4  ;;  %s2175_s24 = smov [#allocation4]   ;;  %s2994_s28 = int_to_ptr.vmem [resolvable:$true] %s1408_s28 }
 0x4b4   : > { %s1404_s10 = sadd.s32 %s1963_s13, %s1566_s30  ;;  %s2074_s23 = scalar_lea.vmem %s2994_s28, %s2987_s5 }
 0x4b5   : > { %s1569_s18 = sshll.u32 %s1404_s10, 7  ;;  %p2075_p2 = scmp.ne.s32.totalorder %s2994_s28, %s2074_s23 }
 0x4b6   : > { %s2999_s12 = scalar_lea.hbm %s3058_s4, %s1569_s18  ;;  %s2078_s19 = sshll.u32 %s2175_s24, 4  ;;  %s2079_s19 = int_to_ptr.vmem [resolvable:$false] %s2078_s19 }
 0x4b7   : > { %p2076_p3 = pnand %p2075_p2, %p1568_p1  ;;  %s2080_s11 = scalar_lea.vmem %s2079_s19, 2048 }
 0x4b8   : > { %p2081_p5 = scmp.lt.s32.totalorder %s2994_s28, %s2079_s19  ;;  %p2082_p6 = scmp.lt.s32.totalorder %s2080_s11, %s2074_s23 }
 0x4b9   : > { %p2077_p4 = pneg %p2076_p3 }
 0x4ba   : > { %p2083_p7 = por %p2082_p6, %p2081_p5 }
 0x4bc   : > { %p2084_p9 = pnand %p2083_p7, %p2077_p4 }
 0x4be   : > { %2087 = shalt.err (!%p2084_p9)
}
 0x4bf   : > { %s2088_s30 = scalar_lea.hbm %s2999_s12, %s2987_s5  ;;  %s2092_s13 = scalar_lea.hbm %s3058_s4, 6400 }
 0x4c0   : > { %p2089_p10 = scmp.ne.s32.totalorder %s2999_s12, %s2088_s30  ;;  %p2093_p13 = scmp.lt.u32.totalorder %s2999_s12, %s3058_s4 }
 0x4c1   : > { %p2094_p0 = scmp.lt.u32.totalorder %s2092_s13, %s2088_s30  ;;  %p2096_p3 = scmp.lt.u32.totalorder %s2088_s30, %s2999_s12 }
 0x4c2   : > { %p2090_p11 = pnand %p2089_p10, %p1568_p1 }
 0x4c3   : > { %p2095_p2 = por %p2094_p0, %p2093_p13 }
 0x4c4   : > { %p2091_p12 = pneg %p2090_p11 }
 0x4c5   : > { %p2097_p4 = por %p2096_p3, %p2095_p2 }
 0x4c7   : > { %p2098_p5 = pnand %p2097_p4, %p2091_p12 }
 0x4c9   : > { %2101 = shalt.err (!%p2098_p5)
}
 0x4ca   : > { %s2176_s6 = smov 128   ;;  %s2177_s14 = smov 8  }
 0x4cb   : > { %1414 = dma.vmem_to_hbm [thread:$0]  (%p1568_p1), %s2994_s28, %s2987_s5, %s2999_s12, %s2982_s27, %s2176_s6, %s2176_s6, %s2177_s14  }
 0x4cc PF: > { %p1969_p6 = scmp.ge.s32.totalorder %s2170_s22, 2  ;;  %s1423_s23 = sand.u32 1, %s2142_s15  }
 0x4cd   : > { %s1424_s24 = scalar_lea.sflag [#allocation5], %s1423_s23 }
 0x4ce   : > { %p1966_p7 = pnand %p1969_p6, %p2263_p8 }
 0x4d0   : > { %2137 = dma.done.wait (!%p1966_p7), %s1424_s24, 1024  }
 0x4d1   : > { %2139 = vsyncadd (!%p1966_p7), %s1424_s24, 4294966272  ;;  %s17_s22 = sadd.s32 1, %s2170_s22   ;;  %s3080_s15 = smov %s2146_s16 }
 0x4d2   : > { %p14_p9 = scmp.ge.s32.totalorder %s17_s22, 10   ;;  %s3081_s16 = smov %s2150_s17 }
 0x4d3   : > { %s3082_s17 = smov %s2272_s7  ;;  %s3083_s18 = smov %s2162_s20 }
 0x4d4   : > { %s3084_s19 = smov %s2166_s21  ;;  %s3085_s20 = smov %s3088_s25 }
 0x4d5   : > { %s3086_s21 = smov %s3092_s26  ;;  %16 = sbr.rel (!%p14_p9) target bundleno = 5 (0x5), region = 183 }
 0x4dc   :  { %1429 = vsyncpa [#allocation5], 1 }
 0x4dd   :  { %1431 = vsyncpa [#allocation5 + $0x1], 1 }
 0x4de   :  { %1432 = vsyncmov [#allocation3] }
 0x4e1   :  { %s1433_s29 = vpop.sfrf %1432 }
 0x4e2   :  { %p1574_p8 = scmp.ne.s32.totalorder %s1433_s29, 0 }
 0x4e4   :  { %1437 = shalt.err (%p1574_p8)  }
 0x4e5   :  { %1439 = vsyncmov [#allocation3 + $0x1] }
 0x4e8   :  { %s1440_s27 = vpop.sfrf %1439 }
 0x4e9   :  { %p1575_p1 = scmp.ne.s32.totalorder %s1440_s27, 0 }
 0x4eb   :  { %1444 = shalt.err (%p1575_p1)  }

</bundles_post_ra>
